<compile_context>
chip_gen: v6e
topology: v6e:2x2x1
jax: 0.10.0
libtpu: 0.0.40
codegen_flags: <defaults>
</compile_context>

<pallas_src>
import jax
import jax.numpy as jnp
from jax import lax
from jax.experimental import pallas as pl
from jax.experimental.pallas import tpu as pltpu

# ----- small, deterministic problem sizes -----
T = 8       # tgt_len
B = 2       # batch
S = 10      # src_len (memory bank length)
H = 32      # hidden_size
E = 32      # embedding dim (= rnn input size for StdRNNDecoder)
VOCAB = 20
PAD = 0


# ---------------------------------------------------------------------------
# Fused kernel: GRU recurrence over time + GlobalAttention ('general') over the
# whole decoded sequence.  Entire problem lives in VMEM; grid = (1,).
#   emb_flat [T*B, E] (row = t*B + b)   h0 [B, H]
#   w_ih [E, 3H]  w_hh [H, 3H]  b_ih/b_hh [1, 3H]   (gate order r,z,n == nn.GRU)
#   mem [B, S, H] (batch-major)   wa [H, H]   wout [2H, H] (rows 0:H ctx, H:2H hid)
#   outputs (time-major): out [T, B, H], align [T, B, S], h_final [B, H]
# ---------------------------------------------------------------------------
def decoder_kernel(lens_ref,                                 # SMEM [B] (scalar prefetch)
                   emb_ref, h0_ref, wih_ref, whh_ref, bih_ref, bhh_ref,
                   mem_ref, wa_ref, wout_ref,                # VMEM inputs
                   out_ref, align_ref, hfin_ref,             # VMEM outputs
                   gi_ref, hs_ref):                          # VMEM scratch
    # ------------- GRU (1 layer; gate order r,z,n == torch.nn.GRU) -------------
    # Loop-invariant weight/bias loads hoisted out of the recurrence.
    whh = whh_ref[...]                                   # [H, 3H]
    bih = bih_ref[...]                                   # [1, 3H]
    bhh = bhh_ref[...]                                   # [1, 3H]
    col = lax.broadcasted_iota(jnp.int32, (1, 3 * H), 1)
    bias_rz = bih + jnp.where(col < 2 * H, bhh, 0.0)     # b_ih + [b_hr, b_hz, 0]
    bhn = bhh[:, 2 * H:]                                 # [1, H] stays inside n-gate

    # Input projections for ALL timesteps with one MXU matmul; stage in VMEM
    # scratch so the recurrence does cheap 2-row loads instead of vreg extracts.
    gi_ref[...] = jnp.dot(emb_ref[...], wih_ref[...],
                          preferred_element_type=jnp.float32) + bias_rz   # [T*B, 3H]

    h = h0_ref[...]                                      # [B, H] f32 (never requantized)
    for t in range(T):                                   # static unroll (T=8)
        gi = gi_ref[t * B:(t + 1) * B, :]                # [B, 3H] contiguous vld
        gh = jnp.dot(h, whh, preferred_element_type=jnp.float32)   # [B, 3H]
        rz = jax.nn.sigmoid(gi[:, :2 * H] + gh[:, :2 * H])          # fused r,z
        r = rz[:, :H]
        z = rz[:, H:]
        n = jnp.tanh(gi[:, 2 * H:] + r * (gh[:, 2 * H:] + bhn))
        h = (1.0 - z) * n + z * h
        hs_ref[:, t, :] = h                              # batch-major scratch [B,T,H]
    hfin_ref[...] = h

    # ---------- GlobalAttention ('general'); B=2 static unroll, no grid steps ----------
    wa = wa_ref[...]                                     # [H, H]
    wout_c = wout_ref[:H, :]                             # [H, H]  W_out (ctx rows)
    wout_h = wout_ref[H:, :]                             # [H, H]  W_out (hidden rows)
    src_pos = lax.broadcasted_iota(jnp.int32, (T, S), 1)

    for b in range(B):
        hd_b = hs_ref[b]                                 # [T, H] leading-axis view
        mem_b = mem_ref[b]                               # [S, H] leading-axis view
        hq = jnp.dot(hd_b, wa, preferred_element_type=jnp.float32)      # [T, H]
        # score(h_t, h_s) = h_t^T Wa h_s  (contract over H; no explicit transpose)
        scores = lax.dot_general(hq, mem_b, (((1,), (1,)), ((), ())),
                                 preferred_element_type=jnp.float32)    # [T, S]
        scores = jnp.where(src_pos < lens_ref[b], scores, -1e30)
        m = jnp.max(scores, axis=-1, keepdims=True)
        p = jnp.exp(scores - m)
        align = p / jnp.sum(p, axis=-1, keepdims=True)                  # [T, S]
        ctx = jnp.dot(align, mem_b, preferred_element_type=jnp.float32)  # [T, H]
        # Output projection without lane concat: tanh(ctx @ Wc + h @ Wh).
        out_b = jnp.tanh(
            jnp.dot(ctx, wout_c, preferred_element_type=jnp.float32)
            + jnp.dot(hd_b, wout_h, preferred_element_type=jnp.float32))
        out_ref[:, b, :] = out_b                         # time-major strided store
        align_ref[:, b, :] = align


def run_decoder(emb_flat, h0, memory_bank_bsh, params, memory_lengths):
    grid_spec = pltpu.PrefetchScalarGridSpec(
        num_scalar_prefetch=1,
        grid=(1,),                                              # single fused invocation
        in_specs=[
            pl.BlockSpec((T * B, E), lambda i, lens: (0, 0)),       # emb (rows t*B + b)
            pl.BlockSpec((B, H), lambda i, lens: (0, 0)),           # h0
            pl.BlockSpec((E, 3 * H), lambda i, lens: (0, 0)),       # w_ih
            pl.BlockSpec((H, 3 * H), lambda i, lens: (0, 0)),       # w_hh
            pl.BlockSpec((1, 3 * H), lambda i, lens: (0, 0)),       # b_ih
            pl.BlockSpec((1, 3 * H), lambda i, lens: (0, 0)),       # b_hh
            pl.BlockSpec((B, S, H), lambda i, lens: (0, 0, 0)),     # memory_bank [B,S,H]
            pl.BlockSpec((H, H), lambda i, lens: (0, 0)),           # wa
            pl.BlockSpec((2 * H, H), lambda i, lens: (0, 0)),       # wout
        ],
        out_specs=[
            pl.BlockSpec((T, B, H), lambda i, lens: (0, 0, 0)),     # attn output (time-major)
            pl.BlockSpec((T, B, S), lambda i, lens: (0, 0, 0)),     # alignments (time-major)
            pl.BlockSpec((B, H), lambda i, lens: (0, 0)),           # final hidden
        ],
        scratch_shapes=[pltpu.VMEM((T * B, 3 * H), jnp.float32),    # staged input projections
                        pltpu.VMEM((B, T, H), jnp.float32)],        # decoded hidden states
    )
    cost = pl.CostEstimate(flops=320_000, transcendentals=2_300, bytes_accessed=45_000)
    return pl.pallas_call(
        decoder_kernel,
        out_shape=(jax.ShapeDtypeStruct((T, B, H), jnp.float32),
                   jax.ShapeDtypeStruct((T, B, S), jnp.float32),
                   jax.ShapeDtypeStruct((B, H), jnp.float32)),
        grid_spec=grid_spec,
        compiler_params=pltpu.CompilerParams(dimension_semantics=("arbitrary",)),
        cost_estimate=cost,
    )(memory_lengths, emb_flat, h0, params["w_ih"], params["w_hh"],
      params["b_ih"], params["b_hh"], memory_bank_bsh, params["wa"], params["wout"])


# ---------------------------------------------------------------------------
# Decoder state (JAX analogue of RNNDecoderState) and module glue.
# ---------------------------------------------------------------------------
def init_decoder_state(encoder_final):
    # bidirectional_encoder=False -> no _fix_enc_hidden reshuffle needed.
    hidden = (encoder_final,)                                   # [layers=1, B, H]
    input_feed = jnp.zeros((1, B, H), jnp.float32)
    return {"hidden": hidden, "input_feed": input_feed, "coverage": None}


def get_final_non_pad_output(tgt, outputs):
    mask = (tgt != PAD).astype(jnp.int32)                       # [T, B]
    last_ind = jnp.maximum(jnp.sum(mask, axis=0) - 1, 0)        # [B]
    return outputs[last_ind, jnp.arange(B)]                     # [B, H]


def decoder_forward(params, tgt, memory_bank, state, memory_lengths):
    # embeddings lookup (glue); flatten to rows t*B + b (free contiguous reshape).
    emb = params["emb_table"][tgt]                              # [T, B, E]
    emb_flat = emb.reshape(T * B, E)
    h0 = state["hidden"][0][0]                                  # layer 0 -> [B, H]
    # Batch-major memory bank for free leading-axis views in-kernel (tiny transpose;
    # ideally the encoder would emit [B, S, H] directly).
    mem_bsh = jnp.transpose(memory_bank, (1, 0, 2))             # [B, S, H]

    # _run_forward_pass: fused GRU + GlobalAttention Pallas kernel (time-major outs)
    decoder_outputs, align_tbs, h_final = run_decoder(
        emb_flat, h0, mem_bsh, params, memory_lengths)

    attns = {"std": align_tbs}                                  # [T, B, S]
    # dropout p=0.0 -> identity

    final_output = get_final_non_pad_output(tgt, decoder_outputs)   # [B, H]
    decoder_final = h_final[None]                                    # [1, B, H]
    new_state = {"hidden": (decoder_final,),
                 "input_feed": final_output[None],
                 "coverage": None}
    return decoder_outputs, new_state, attns


# ---------------------------------------------------------------------------
if __name__ == "__main__":
    key = jax.random.PRNGKey(0)
    ks = jax.random.split(key, 10)
    scale = 0.1

    params = {
        "emb_table": jax.random.normal(ks[0], (VOCAB, E), jnp.float32) * scale,
        "w_ih": jax.random.normal(ks[1], (E, 3 * H), jnp.float32) * scale,
        "w_hh": jax.random.normal(ks[2], (H, 3 * H), jnp.float32) * scale,
        "b_ih": jax.random.normal(ks[3], (1, 3 * H), jnp.float32) * scale,
        "b_hh": jax.random.normal(ks[4], (1, 3 * H), jnp.float32) * scale,
        "wa": jax.random.normal(ks[5], (H, H), jnp.float32) * scale,
        "wout": jax.random.normal(ks[6], (2 * H, H), jnp.float32) * scale,
    }

    # target tokens [T, B] with trailing pads for batch element 1
    tgt = jax.random.randint(ks[7], (T, B), 1, VOCAB, dtype=jnp.int32)
    tgt = tgt.at[T - 2:, 1].set(PAD)

    memory_bank = jax.random.normal(ks[8], (S, B, H), jnp.float32) * 0.5
    memory_lengths = jnp.array([S, 7], dtype=jnp.int32)
    encoder_final = jax.random.normal(ks[9], (1, B, H), jnp.float32) * 0.5

    state = init_decoder_state(encoder_final)
    fwd = jax.jit(decoder_forward)
    decoder_outputs, new_state, attns = fwd(
        params, tgt, memory_bank, state, memory_lengths)

    jax.block_until_ready((decoder_outputs, new_state["hidden"][0],
                           new_state["input_feed"], attns["std"]))

    assert decoder_outputs.shape == (T, B, H)
    assert attns["std"].shape == (T, B, S)
    assert new_state["hidden"][0].shape == (1, B, H)
    assert new_state["input_feed"].shape == (1, B, H)
    assert bool(jnp.all(jnp.isfinite(decoder_outputs)))
    assert bool(jnp.all(jnp.isfinite(attns["std"])))
    assert bool(jnp.all(jnp.isfinite(new_state["hidden"][0])))
    print("KERNEL_OK")
</pallas_src>

<mosaic_0001>
module attributes {stable_mosaic.version = 11 : i64} {
  func.func @decoder_kernel(%arg0: i32, %arg1: memref<2xi32, #tpu.memory_space<smem>>, %arg2: memref<16x32xf32, #tpu.memory_space<vmem>>, %arg3: memref<2x32xf32, #tpu.memory_space<vmem>>, %arg4: memref<32x96xf32, #tpu.memory_space<vmem>>, %arg5: memref<32x96xf32, #tpu.memory_space<vmem>>, %arg6: memref<1x96xf32, #tpu.memory_space<vmem>>, %arg7: memref<1x96xf32, #tpu.memory_space<vmem>>, %arg8: memref<2x10x32xf32, #tpu.memory_space<vmem>>, %arg9: memref<32x32xf32, #tpu.memory_space<vmem>>, %arg10: memref<64x32xf32, #tpu.memory_space<vmem>>, %arg11: memref<8x2x32xf32, #tpu.memory_space<vmem>>, %arg12: memref<8x2x10xf32, #tpu.memory_space<vmem>>, %arg13: memref<2x32xf32, #tpu.memory_space<vmem>>, %arg14: memref<16x96xf32, #tpu.memory_space<vmem>>, %arg15: memref<2x8x32xf32, #tpu.memory_space<vmem>>) attributes {dimension_semantics = [#tpu.dimension_semantics<arbitrary>], iteration_bounds = array<i64: 1>, scalar_prefetch = 1 : i64, scratch_operands = 2 : i64, tpu.core_type = #tpu.core_type<tc>, window_params = [{pipeline_mode = #tpu.pipeline_mode<synchronous>, transform_indices = @transform_0, window_bounds = array<i64: 16, 32>}, {pipeline_mode = #tpu.pipeline_mode<synchronous>, transform_indices = @transform_1, window_bounds = array<i64: 2, 32>}, {pipeline_mode = #tpu.pipeline_mode<synchronous>, transform_indices = @transform_2, window_bounds = array<i64: 32, 96>}, {pipeline_mode = #tpu.pipeline_mode<synchronous>, transform_indices = @transform_3, window_bounds = array<i64: 32, 96>}, {pipeline_mode = #tpu.pipeline_mode<synchronous>, transform_indices = @transform_4, window_bounds = array<i64: 1, 96>}, {pipeline_mode = #tpu.pipeline_mode<synchronous>, transform_indices = @transform_5, window_bounds = array<i64: 1, 96>}, {pipeline_mode = #tpu.pipeline_mode<synchronous>, transform_indices = @transform_6, window_bounds = array<i64: 2, 10, 32>}, {pipeline_mode = #tpu.pipeline_mode<synchronous>, transform_indices = @transform_7, window_bounds = array<i64: 32, 32>}, {pipeline_mode = #tpu.pipeline_mode<synchronous>, transform_indices = @transform_8, window_bounds = array<i64: 64, 32>}, {pipeline_mode = #tpu.pipeline_mode<synchronous>, transform_indices = @transform_9, window_bounds = array<i64: 8, 2, 32>}, {pipeline_mode = #tpu.pipeline_mode<synchronous>, transform_indices = @transform_10, window_bounds = array<i64: 8, 2, 10>}, {pipeline_mode = #tpu.pipeline_mode<synchronous>, transform_indices = @transform_11, window_bounds = array<i64: 2, 32>}]} {
    %c0 = arith.constant 0 : index
    %c0_0 = arith.constant 0 : index
    %0 = vector.load %arg5[%c0, %c0_0] : memref<32x96xf32, #tpu.memory_space<vmem>>, vector<32x96xf32>
    %c0_1 = arith.constant 0 : index
    %c0_2 = arith.constant 0 : index
    %1 = vector.load %arg6[%c0_1, %c0_2] : memref<1x96xf32, #tpu.memory_space<vmem>>, vector<1x96xf32>
    %c0_3 = arith.constant 0 : index
    %c0_4 = arith.constant 0 : index
    %2 = vector.load %arg7[%c0_3, %c0_4] : memref<1x96xf32, #tpu.memory_space<vmem>>, vector<1x96xf32>
    %3 = tpu.iota {dimensions = array<i32: 1>} : vector<1x96xi32>
    %c64_i32 = arith.constant 64 : i32
    %4 = vector.broadcast %c64_i32 : i32 to vector<1x96xi32>
    %5 = arith.cmpi slt, %3, %4 : vector<1x96xi32>
    %cst = arith.constant 0.000000e+00 : f32
    %6 = vector.broadcast %cst : f32 to vector<1x96xf32>
    %7 = arith.select %5, %2, %6 : vector<1x96xi1>, vector<1x96xf32>
    %8 = arith.addf %1, %7 : vector<1x96xf32>
    %9 = vector.extract_strided_slice %2 {offsets = [0, 64], sizes = [1, 32], strides = [1, 1]} : vector<1x96xf32> to vector<1x32xf32>
    %c0_5 = arith.constant 0 : index
    %c0_6 = arith.constant 0 : index
    %10 = vector.load %arg2[%c0_5, %c0_6] : memref<16x32xf32, #tpu.memory_space<vmem>>, vector<16x32xf32>
    %c0_7 = arith.constant 0 : index
    %c0_8 = arith.constant 0 : index
    %11 = vector.load %arg4[%c0_7, %c0_8] : memref<32x96xf32, #tpu.memory_space<vmem>>, vector<32x96xf32>
    %cst_9 = arith.constant dense<0.000000e+00> : vector<16x96xf32>
    %12 = tpu.matmul %10, %11, %cst_9 {dimension_numbers = #tpu.dot_dimension_numbers<[1], [0], [0], [1], [0, 0, 1, 1], [], []>} : vector<16x32xf32>, vector<32x96xf32>, vector<16x96xf32> -> vector<16x96xf32>
    %13 = vector.broadcast %8 : vector<1x96xf32> to vector<16x96xf32>
    %14 = arith.addf %12, %13 : vector<16x96xf32>
    %c0_10 = arith.constant 0 : index
    %c0_11 = arith.constant 0 : index
    %15 = vector.load %arg14[%c0_10, %c0_11] : memref<16x96xf32, #tpu.memory_space<vmem>>, vector<16x96xf32>
    tpu.vector_store %arg14[%c0_10, %c0_11], %14 {strides = array<i32>} : memref<16x96xf32, #tpu.memory_space<vmem>>, vector<16x96xf32>,
    %c0_12 = arith.constant 0 : index
    %c0_13 = arith.constant 0 : index
    %16 = vector.load %arg3[%c0_12, %c0_13] : memref<2x32xf32, #tpu.memory_space<vmem>>, vector<2x32xf32>
    %c0_14 = arith.constant 0 : index
    %c0_15 = arith.constant 0 : index
    %17 = vector.load %arg14[%c0_14, %c0_15] : memref<16x96xf32, #tpu.memory_space<vmem>>, vector<2x96xf32>
    %cst_16 = arith.constant dense<0.000000e+00> : vector<2x96xf32>
    %18 = tpu.matmul %16, %0, %cst_16 {dimension_numbers = #tpu.dot_dimension_numbers<[1], [0], [0], [1], [0, 0, 1, 1], [], []>} : vector<2x32xf32>, vector<32x96xf32>, vector<2x96xf32> -> vector<2x96xf32>
    %19 = vector.extract_strided_slice %17 {offsets = [0, 0], sizes = [2, 64], strides = [1, 1]} : vector<2x96xf32> to vector<2x64xf32>
    %20 = vector.extract_strided_slice %18 {offsets = [0, 0], sizes = [2, 64], strides = [1, 1]} : vector<2x96xf32> to vector<2x64xf32>
    %21 = arith.addf %19, %20 : vector<2x64xf32>
    %22 = arith.negf %21 : vector<2x64xf32>
    %23 = math.exp %22 : vector<2x64xf32>
    %cst_17 = arith.constant 1.000000e+00 : f32
    %24 = vector.broadcast %cst_17 : f32 to vector<2x64xf32>
    %25 = arith.addf %24, %23 : vector<2x64xf32>
    %26 = arith.divf %24, %25 : vector<2x64xf32>
    %27 = vector.extract_strided_slice %26 {offsets = [0, 0], sizes = [2, 32], strides = [1, 1]} : vector<2x64xf32> to vector<2x32xf32>
    %28 = vector.extract_strided_slice %26 {offsets = [0, 32], sizes = [2, 32], strides = [1, 1]} : vector<2x64xf32> to vector<2x32xf32>
    %29 = vector.extract_strided_slice %17 {offsets = [0, 64], sizes = [2, 32], strides = [1, 1]} : vector<2x96xf32> to vector<2x32xf32>
    %30 = vector.extract_strided_slice %18 {offsets = [0, 64], sizes = [2, 32], strides = [1, 1]} : vector<2x96xf32> to vector<2x32xf32>
    %31 = vector.broadcast %9 : vector<1x32xf32> to vector<2x32xf32>
    %32 = arith.addf %30, %31 : vector<2x32xf32>
    %33 = arith.mulf %27, %32 : vector<2x32xf32>
    %34 = arith.addf %29, %33 : vector<2x32xf32>
    %35 = math.tanh %34 : vector<2x32xf32>
    %cst_18 = arith.constant 1.000000e+00 : f32
    %36 = vector.broadcast %cst_18 : f32 to vector<2x32xf32>
    %37 = arith.subf %36, %28 : vector<2x32xf32>
    %38 = arith.mulf %37, %35 : vector<2x32xf32>
    %39 = arith.mulf %28, %16 : vector<2x32xf32>
    %40 = arith.addf %38, %39 : vector<2x32xf32>
    %c0_19 = arith.constant 0 : index
    %c0_20 = arith.constant 0 : index
    %c0_21 = arith.constant 0 : index
    %41 = vector.load %arg15[%c0_19, %c0_20, %c0_21] : memref<2x8x32xf32, #tpu.memory_space<vmem>>, vector<2x1x32xf32>
    %42 = vector.shape_cast %41 : vector<2x1x32xf32> to vector<2x32xf32>
    %43 = vector.shape_cast %40 : vector<2x32xf32> to vector<2x1x32xf32>
    tpu.vector_store %arg15[%c0_19, %c0_20, %c0_21], %43 {strides = array<i32>} : memref<2x8x32xf32, #tpu.memory_space<vmem>>, vector<2x1x32xf32>,
    %c2 = arith.constant 2 : index
    %c0_22 = arith.constant 0 : index
    %44 = vector.load %arg14[%c2, %c0_22] : memref<16x96xf32, #tpu.memory_space<vmem>>, vector<2x96xf32>
    %cst_23 = arith.constant dense<0.000000e+00> : vector<2x96xf32>
    %45 = tpu.matmul %40, %0, %cst_23 {dimension_numbers = #tpu.dot_dimension_numbers<[1], [0], [0], [1], [0, 0, 1, 1], [], []>} : vector<2x32xf32>, vector<32x96xf32>, vector<2x96xf32> -> vector<2x96xf32>
    %46 = vector.extract_strided_slice %44 {offsets = [0, 0], sizes = [2, 64], strides = [1, 1]} : vector<2x96xf32> to vector<2x64xf32>
    %47 = vector.extract_strided_slice %45 {offsets = [0, 0], sizes = [2, 64], strides = [1, 1]} : vector<2x96xf32> to vector<2x64xf32>
    %48 = arith.addf %46, %47 : vector<2x64xf32>
    %49 = arith.negf %48 : vector<2x64xf32>
    %50 = math.exp %49 : vector<2x64xf32>
    %cst_24 = arith.constant 1.000000e+00 : f32
    %51 = vector.broadcast %cst_24 : f32 to vector<2x64xf32>
    %52 = arith.addf %51, %50 : vector<2x64xf32>
    %53 = arith.divf %51, %52 : vector<2x64xf32>
    %54 = vector.extract_strided_slice %53 {offsets = [0, 0], sizes = [2, 32], strides = [1, 1]} : vector<2x64xf32> to vector<2x32xf32>
    %55 = vector.extract_strided_slice %53 {offsets = [0, 32], sizes = [2, 32], strides = [1, 1]} : vector<2x64xf32> to vector<2x32xf32>
    %56 = vector.extract_strided_slice %44 {offsets = [0, 64], sizes = [2, 32], strides = [1, 1]} : vector<2x96xf32> to vector<2x32xf32>
    %57 = vector.extract_strided_slice %45 {offsets = [0, 64], sizes = [2, 32], strides = [1, 1]} : vector<2x96xf32> to vector<2x32xf32>
    %58 = vector.broadcast %9 : vector<1x32xf32> to vector<2x32xf32>
    %59 = arith.addf %57, %58 : vector<2x32xf32>
    %60 = arith.mulf %54, %59 : vector<2x32xf32>
    %61 = arith.addf %56, %60 : vector<2x32xf32>
    %62 = math.tanh %61 : vector<2x32xf32>
    %cst_25 = arith.constant 1.000000e+00 : f32
    %63 = vector.broadcast %cst_25 : f32 to vector<2x32xf32>
    %64 = arith.subf %63, %55 : vector<2x32xf32>
    %65 = arith.mulf %64, %62 : vector<2x32xf32>
    %66 = arith.mulf %55, %40 : vector<2x32xf32>
    %67 = arith.addf %65, %66 : vector<2x32xf32>
    %c0_26 = arith.constant 0 : index
    %c1 = arith.constant 1 : index
    %c0_27 = arith.constant 0 : index
    %68 = vector.load %arg15[%c0_26, %c1, %c0_27] : memref<2x8x32xf32, #tpu.memory_space<vmem>>, vector<2x1x32xf32>
    %69 = vector.shape_cast %68 : vector<2x1x32xf32> to vector<2x32xf32>
    %70 = vector.shape_cast %67 : vector<2x32xf32> to vector<2x1x32xf32>
    tpu.vector_store %arg15[%c0_26, %c1, %c0_27], %70 {strides = array<i32>} : memref<2x8x32xf32, #tpu.memory_space<vmem>>, vector<2x1x32xf32>,
    %c4 = arith.constant 4 : index
    %c0_28 = arith.constant 0 : index
    %71 = vector.load %arg14[%c4, %c0_28] : memref<16x96xf32, #tpu.memory_space<vmem>>, vector<2x96xf32>
    %cst_29 = arith.constant dense<0.000000e+00> : vector<2x96xf32>
    %72 = tpu.matmul %67, %0, %cst_29 {dimension_numbers = #tpu.dot_dimension_numbers<[1], [0], [0], [1], [0, 0, 1, 1], [], []>} : vector<2x32xf32>, vector<32x96xf32>, vector<2x96xf32> -> vector<2x96xf32>
    %73 = vector.extract_strided_slice %71 {offsets = [0, 0], sizes = [2, 64], strides = [1, 1]} : vector<2x96xf32> to vector<2x64xf32>
    %74 = vector.extract_strided_slice %72 {offsets = [0, 0], sizes = [2, 64], strides = [1, 1]} : vector<2x96xf32> to vector<2x64xf32>
    %75 = arith.addf %73, %74 : vector<2x64xf32>
    %76 = arith.negf %75 : vector<2x64xf32>
    %77 = math.exp %76 : vector<2x64xf32>
    %cst_30 = arith.constant 1.000000e+00 : f32
    %78 = vector.broadcast %cst_30 : f32 to vector<2x64xf32>
    %79 = arith.addf %78, %77 : vector<2x64xf32>
    %80 = arith.divf %78, %79 : vector<2x64xf32>
    %81 = vector.extract_strided_slice %80 {offsets = [0, 0], sizes = [2, 32], strides = [1, 1]} : vector<2x64xf32> to vector<2x32xf32>
    %82 = vector.extract_strided_slice %80 {offsets = [0, 32], sizes = [2, 32], strides = [1, 1]} : vector<2x64xf32> to vector<2x32xf32>
    %83 = vector.extract_strided_slice %71 {offsets = [0, 64], sizes = [2, 32], strides = [1, 1]} : vector<2x96xf32> to vector<2x32xf32>
    %84 = vector.extract_strided_slice %72 {offsets = [0, 64], sizes = [2, 32], strides = [1, 1]} : vector<2x96xf32> to vector<2x32xf32>
    %85 = vector.broadcast %9 : vector<1x32xf32> to vector<2x32xf32>
    %86 = arith.addf %84, %85 : vector<2x32xf32>
    %87 = arith.mulf %81, %86 : vector<2x32xf32>
    %88 = arith.addf %83, %87 : vector<2x32xf32>
    %89 = math.tanh %88 : vector<2x32xf32>
    %cst_31 = arith.constant 1.000000e+00 : f32
    %90 = vector.broadcast %cst_31 : f32 to vector<2x32xf32>
    %91 = arith.subf %90, %82 : vector<2x32xf32>
    %92 = arith.mulf %91, %89 : vector<2x32xf32>
    %93 = arith.mulf %82, %67 : vector<2x32xf32>
    %94 = arith.addf %92, %93 : vector<2x32xf32>
    %c0_32 = arith.constant 0 : index
    %c2_33 = arith.constant 2 : index
    %c0_34 = arith.constant 0 : index
    %95 = vector.load %arg15[%c0_32, %c2_33, %c0_34] : memref<2x8x32xf32, #tpu.memory_space<vmem>>, vector<2x1x32xf32>
    %96 = vector.shape_cast %95 : vector<2x1x32xf32> to vector<2x32xf32>
    %97 = vector.shape_cast %94 : vector<2x32xf32> to vector<2x1x32xf32>
    tpu.vector_store %arg15[%c0_32, %c2_33, %c0_34], %97 {strides = array<i32>} : memref<2x8x32xf32, #tpu.memory_space<vmem>>, vector<2x1x32xf32>,
    %c6 = arith.constant 6 : index
    %c0_35 = arith.constant 0 : index
    %98 = vector.load %arg14[%c6, %c0_35] : memref<16x96xf32, #tpu.memory_space<vmem>>, vector<2x96xf32>
    %cst_36 = arith.constant dense<0.000000e+00> : vector<2x96xf32>
    %99 = tpu.matmul %94, %0, %cst_36 {dimension_numbers = #tpu.dot_dimension_numbers<[1], [0], [0], [1], [0, 0, 1, 1], [], []>} : vector<2x32xf32>, vector<32x96xf32>, vector<2x96xf32> -> vector<2x96xf32>
    %100 = vector.extract_strided_slice %98 {offsets = [0, 0], sizes = [2, 64], strides = [1, 1]} : vector<2x96xf32> to vector<2x64xf32>
    %101 = vector.extract_strided_slice %99 {offsets = [0, 0], sizes = [2, 64], strides = [1, 1]} : vector<2x96xf32> to vector<2x64xf32>
    %102 = arith.addf %100, %101 : vector<2x64xf32>
    %103 = arith.negf %102 : vector<2x64xf32>
    %104 = math.exp %103 : vector<2x64xf32>
    %cst_37 = arith.constant 1.000000e+00 : f32
    %105 = vector.broadcast %cst_37 : f32 to vector<2x64xf32>
    %106 = arith.addf %105, %104 : vector<2x64xf32>
    %107 = arith.divf %105, %106 : vector<2x64xf32>
    %108 = vector.extract_strided_slice %107 {offsets = [0, 0], sizes = [2, 32], strides = [1, 1]} : vector<2x64xf32> to vector<2x32xf32>
    %109 = vector.extract_strided_slice %107 {offsets = [0, 32], sizes = [2, 32], strides = [1, 1]} : vector<2x64xf32> to vector<2x32xf32>
    %110 = vector.extract_strided_slice %98 {offsets = [0, 64], sizes = [2, 32], strides = [1, 1]} : vector<2x96xf32> to vector<2x32xf32>
    %111 = vector.extract_strided_slice %99 {offsets = [0, 64], sizes = [2, 32], strides = [1, 1]} : vector<2x96xf32> to vector<2x32xf32>
    %112 = vector.broadcast %9 : vector<1x32xf32> to vector<2x32xf32>
    %113 = arith.addf %111, %112 : vector<2x32xf32>
    %114 = arith.mulf %108, %113 : vector<2x32xf32>
    %115 = arith.addf %110, %114 : vector<2x32xf32>
    %116 = math.tanh %115 : vector<2x32xf32>
    %cst_38 = arith.constant 1.000000e+00 : f32
    %117 = vector.broadcast %cst_38 : f32 to vector<2x32xf32>
    %118 = arith.subf %117, %109 : vector<2x32xf32>
    %119 = arith.mulf %118, %116 : vector<2x32xf32>
    %120 = arith.mulf %109, %94 : vector<2x32xf32>
    %121 = arith.addf %119, %120 : vector<2x32xf32>
    %c0_39 = arith.constant 0 : index
    %c3 = arith.constant 3 : index
    %c0_40 = arith.constant 0 : index
    %122 = vector.load %arg15[%c0_39, %c3, %c0_40] : memref<2x8x32xf32, #tpu.memory_space<vmem>>, vector<2x1x32xf32>
    %123 = vector.shape_cast %122 : vector<2x1x32xf32> to vector<2x32xf32>
    %124 = vector.shape_cast %121 : vector<2x32xf32> to vector<2x1x32xf32>
    tpu.vector_store %arg15[%c0_39, %c3, %c0_40], %124 {strides = array<i32>} : memref<2x8x32xf32, #tpu.memory_space<vmem>>, vector<2x1x32xf32>,
    %c8 = arith.constant 8 : index
    %c0_41 = arith.constant 0 : index
    %125 = vector.load %arg14[%c8, %c0_41] : memref<16x96xf32, #tpu.memory_space<vmem>>, vector<2x96xf32>
    %cst_42 = arith.constant dense<0.000000e+00> : vector<2x96xf32>
    %126 = tpu.matmul %121, %0, %cst_42 {dimension_numbers = #tpu.dot_dimension_numbers<[1], [0], [0], [1], [0, 0, 1, 1], [], []>} : vector<2x32xf32>, vector<32x96xf32>, vector<2x96xf32> -> vector<2x96xf32>
    %127 = vector.extract_strided_slice %125 {offsets = [0, 0], sizes = [2, 64], strides = [1, 1]} : vector<2x96xf32> to vector<2x64xf32>
    %128 = vector.extract_strided_slice %126 {offsets = [0, 0], sizes = [2, 64], strides = [1, 1]} : vector<2x96xf32> to vector<2x64xf32>
    %129 = arith.addf %127, %128 : vector<2x64xf32>
    %130 = arith.negf %129 : vector<2x64xf32>
    %131 = math.exp %130 : vector<2x64xf32>
    %cst_43 = arith.constant 1.000000e+00 : f32
    %132 = vector.broadcast %cst_43 : f32 to vector<2x64xf32>
    %133 = arith.addf %132, %131 : vector<2x64xf32>
    %134 = arith.divf %132, %133 : vector<2x64xf32>
    %135 = vector.extract_strided_slice %134 {offsets = [0, 0], sizes = [2, 32], strides = [1, 1]} : vector<2x64xf32> to vector<2x32xf32>
    %136 = vector.extract_strided_slice %134 {offsets = [0, 32], sizes = [2, 32], strides = [1, 1]} : vector<2x64xf32> to vector<2x32xf32>
    %137 = vector.extract_strided_slice %125 {offsets = [0, 64], sizes = [2, 32], strides = [1, 1]} : vector<2x96xf32> to vector<2x32xf32>
    %138 = vector.extract_strided_slice %126 {offsets = [0, 64], sizes = [2, 32], strides = [1, 1]} : vector<2x96xf32> to vector<2x32xf32>
    %139 = vector.broadcast %9 : vector<1x32xf32> to vector<2x32xf32>
    %140 = arith.addf %138, %139 : vector<2x32xf32>
    %141 = arith.mulf %135, %140 : vector<2x32xf32>
    %142 = arith.addf %137, %141 : vector<2x32xf32>
    %143 = math.tanh %142 : vector<2x32xf32>
    %cst_44 = arith.constant 1.000000e+00 : f32
    %144 = vector.broadcast %cst_44 : f32 to vector<2x32xf32>
    %145 = arith.subf %144, %136 : vector<2x32xf32>
    %146 = arith.mulf %145, %143 : vector<2x32xf32>
    %147 = arith.mulf %136, %121 : vector<2x32xf32>
    %148 = arith.addf %146, %147 : vector<2x32xf32>
    %c0_45 = arith.constant 0 : index
    %c4_46 = arith.constant 4 : index
    %c0_47 = arith.constant 0 : index
    %149 = vector.load %arg15[%c0_45, %c4_46, %c0_47] : memref<2x8x32xf32, #tpu.memory_space<vmem>>, vector<2x1x32xf32>
    %150 = vector.shape_cast %149 : vector<2x1x32xf32> to vector<2x32xf32>
    %151 = vector.shape_cast %148 : vector<2x32xf32> to vector<2x1x32xf32>
    tpu.vector_store %arg15[%c0_45, %c4_46, %c0_47], %151 {strides = array<i32>} : memref<2x8x32xf32, #tpu.memory_space<vmem>>, vector<2x1x32xf32>,
    %c10 = arith.constant 10 : index
    %c0_48 = arith.constant 0 : index
    %152 = vector.load %arg14[%c10, %c0_48] : memref<16x96xf32, #tpu.memory_space<vmem>>, vector<2x96xf32>
    %cst_49 = arith.constant dense<0.000000e+00> : vector<2x96xf32>
    %153 = tpu.matmul %148, %0, %cst_49 {dimension_numbers = #tpu.dot_dimension_numbers<[1], [0], [0], [1], [0, 0, 1, 1], [], []>} : vector<2x32xf32>, vector<32x96xf32>, vector<2x96xf32> -> vector<2x96xf32>
    %154 = vector.extract_strided_slice %152 {offsets = [0, 0], sizes = [2, 64], strides = [1, 1]} : vector<2x96xf32> to vector<2x64xf32>
    %155 = vector.extract_strided_slice %153 {offsets = [0, 0], sizes = [2, 64], strides = [1, 1]} : vector<2x96xf32> to vector<2x64xf32>
    %156 = arith.addf %154, %155 : vector<2x64xf32>
    %157 = arith.negf %156 : vector<2x64xf32>
    %158 = math.exp %157 : vector<2x64xf32>
    %cst_50 = arith.constant 1.000000e+00 : f32
    %159 = vector.broadcast %cst_50 : f32 to vector<2x64xf32>
    %160 = arith.addf %159, %158 : vector<2x64xf32>
    %161 = arith.divf %159, %160 : vector<2x64xf32>
    %162 = vector.extract_strided_slice %161 {offsets = [0, 0], sizes = [2, 32], strides = [1, 1]} : vector<2x64xf32> to vector<2x32xf32>
    %163 = vector.extract_strided_slice %161 {offsets = [0, 32], sizes = [2, 32], strides = [1, 1]} : vector<2x64xf32> to vector<2x32xf32>
    %164 = vector.extract_strided_slice %152 {offsets = [0, 64], sizes = [2, 32], strides = [1, 1]} : vector<2x96xf32> to vector<2x32xf32>
    %165 = vector.extract_strided_slice %153 {offsets = [0, 64], sizes = [2, 32], strides = [1, 1]} : vector<2x96xf32> to vector<2x32xf32>
    %166 = vector.broadcast %9 : vector<1x32xf32> to vector<2x32xf32>
    %167 = arith.addf %165, %166 : vector<2x32xf32>
    %168 = arith.mulf %162, %167 : vector<2x32xf32>
    %169 = arith.addf %164, %168 : vector<2x32xf32>
    %170 = math.tanh %169 : vector<2x32xf32>
    %cst_51 = arith.constant 1.000000e+00 : f32
    %171 = vector.broadcast %cst_51 : f32 to vector<2x32xf32>
    %172 = arith.subf %171, %163 : vector<2x32xf32>
    %173 = arith.mulf %172, %170 : vector<2x32xf32>
    %174 = arith.mulf %163, %148 : vector<2x32xf32>
    %175 = arith.addf %173, %174 : vector<2x32xf32>
    %c0_52 = arith.constant 0 : index
    %c5 = arith.constant 5 : index
    %c0_53 = arith.constant 0 : index
    %176 = vector.load %arg15[%c0_52, %c5, %c0_53] : memref<2x8x32xf32, #tpu.memory_space<vmem>>, vector<2x1x32xf32>
    %177 = vector.shape_cast %176 : vector<2x1x32xf32> to vector<2x32xf32>
    %178 = vector.shape_cast %175 : vector<2x32xf32> to vector<2x1x32xf32>
    tpu.vector_store %arg15[%c0_52, %c5, %c0_53], %178 {strides = array<i32>} : memref<2x8x32xf32, #tpu.memory_space<vmem>>, vector<2x1x32xf32>,
    %c12 = arith.constant 12 : index
    %c0_54 = arith.constant 0 : index
    %179 = vector.load %arg14[%c12, %c0_54] : memref<16x96xf32, #tpu.memory_space<vmem>>, vector<2x96xf32>
    %cst_55 = arith.constant dense<0.000000e+00> : vector<2x96xf32>
    %180 = tpu.matmul %175, %0, %cst_55 {dimension_numbers = #tpu.dot_dimension_numbers<[1], [0], [0], [1], [0, 0, 1, 1], [], []>} : vector<2x32xf32>, vector<32x96xf32>, vector<2x96xf32> -> vector<2x96xf32>
    %181 = vector.extract_strided_slice %179 {offsets = [0, 0], sizes = [2, 64], strides = [1, 1]} : vector<2x96xf32> to vector<2x64xf32>
    %182 = vector.extract_strided_slice %180 {offsets = [0, 0], sizes = [2, 64], strides = [1, 1]} : vector<2x96xf32> to vector<2x64xf32>
    %183 = arith.addf %181, %182 : vector<2x64xf32>
    %184 = arith.negf %183 : vector<2x64xf32>
    %185 = math.exp %184 : vector<2x64xf32>
    %cst_56 = arith.constant 1.000000e+00 : f32
    %186 = vector.broadcast %cst_56 : f32 to vector<2x64xf32>
    %187 = arith.addf %186, %185 : vector<2x64xf32>
    %188 = arith.divf %186, %187 : vector<2x64xf32>
    %189 = vector.extract_strided_slice %188 {offsets = [0, 0], sizes = [2, 32], strides = [1, 1]} : vector<2x64xf32> to vector<2x32xf32>
    %190 = vector.extract_strided_slice %188 {offsets = [0, 32], sizes = [2, 32], strides = [1, 1]} : vector<2x64xf32> to vector<2x32xf32>
    %191 = vector.extract_strided_slice %179 {offsets = [0, 64], sizes = [2, 32], strides = [1, 1]} : vector<2x96xf32> to vector<2x32xf32>
    %192 = vector.extract_strided_slice %180 {offsets = [0, 64], sizes = [2, 32], strides = [1, 1]} : vector<2x96xf32> to vector<2x32xf32>
    %193 = vector.broadcast %9 : vector<1x32xf32> to vector<2x32xf32>
    %194 = arith.addf %192, %193 : vector<2x32xf32>
    %195 = arith.mulf %189, %194 : vector<2x32xf32>
    %196 = arith.addf %191, %195 : vector<2x32xf32>
    %197 = math.tanh %196 : vector<2x32xf32>
    %cst_57 = arith.constant 1.000000e+00 : f32
    %198 = vector.broadcast %cst_57 : f32 to vector<2x32xf32>
    %199 = arith.subf %198, %190 : vector<2x32xf32>
    %200 = arith.mulf %199, %197 : vector<2x32xf32>
    %201 = arith.mulf %190, %175 : vector<2x32xf32>
    %202 = arith.addf %200, %201 : vector<2x32xf32>
    %c0_58 = arith.constant 0 : index
    %c6_59 = arith.constant 6 : index
    %c0_60 = arith.constant 0 : index
    %203 = vector.load %arg15[%c0_58, %c6_59, %c0_60] : memref<2x8x32xf32, #tpu.memory_space<vmem>>, vector<2x1x32xf32>
    %204 = vector.shape_cast %203 : vector<2x1x32xf32> to vector<2x32xf32>
    %205 = vector.shape_cast %202 : vector<2x32xf32> to vector<2x1x32xf32>
    tpu.vector_store %arg15[%c0_58, %c6_59, %c0_60], %205 {strides = array<i32>} : memref<2x8x32xf32, #tpu.memory_space<vmem>>, vector<2x1x32xf32>,
    %c14 = arith.constant 14 : index
    %c0_61 = arith.constant 0 : index
    %206 = vector.load %arg14[%c14, %c0_61] : memref<16x96xf32, #tpu.memory_space<vmem>>, vector<2x96xf32>
    %cst_62 = arith.constant dense<0.000000e+00> : vector<2x96xf32>
    %207 = tpu.matmul %202, %0, %cst_62 {dimension_numbers = #tpu.dot_dimension_numbers<[1], [0], [0], [1], [0, 0, 1, 1], [], []>} : vector<2x32xf32>, vector<32x96xf32>, vector<2x96xf32> -> vector<2x96xf32>
    %208 = vector.extract_strided_slice %206 {offsets = [0, 0], sizes = [2, 64], strides = [1, 1]} : vector<2x96xf32> to vector<2x64xf32>
    %209 = vector.extract_strided_slice %207 {offsets = [0, 0], sizes = [2, 64], strides = [1, 1]} : vector<2x96xf32> to vector<2x64xf32>
    %210 = arith.addf %208, %209 : vector<2x64xf32>
    %211 = arith.negf %210 : vector<2x64xf32>
    %212 = math.exp %211 : vector<2x64xf32>
    %cst_63 = arith.constant 1.000000e+00 : f32
    %213 = vector.broadcast %cst_63 : f32 to vector<2x64xf32>
    %214 = arith.addf %213, %212 : vector<2x64xf32>
    %215 = arith.divf %213, %214 : vector<2x64xf32>
    %216 = vector.extract_strided_slice %215 {offsets = [0, 0], sizes = [2, 32], strides = [1, 1]} : vector<2x64xf32> to vector<2x32xf32>
    %217 = vector.extract_strided_slice %215 {offsets = [0, 32], sizes = [2, 32], strides = [1, 1]} : vector<2x64xf32> to vector<2x32xf32>
    %218 = vector.extract_strided_slice %206 {offsets = [0, 64], sizes = [2, 32], strides = [1, 1]} : vector<2x96xf32> to vector<2x32xf32>
    %219 = vector.extract_strided_slice %207 {offsets = [0, 64], sizes = [2, 32], strides = [1, 1]} : vector<2x96xf32> to vector<2x32xf32>
    %220 = vector.broadcast %9 : vector<1x32xf32> to vector<2x32xf32>
    %221 = arith.addf %219, %220 : vector<2x32xf32>
    %222 = arith.mulf %216, %221 : vector<2x32xf32>
    %223 = arith.addf %218, %222 : vector<2x32xf32>
    %224 = math.tanh %223 : vector<2x32xf32>
    %cst_64 = arith.constant 1.000000e+00 : f32
    %225 = vector.broadcast %cst_64 : f32 to vector<2x32xf32>
    %226 = arith.subf %225, %217 : vector<2x32xf32>
    %227 = arith.mulf %226, %224 : vector<2x32xf32>
    %228 = arith.mulf %217, %202 : vector<2x32xf32>
    %229 = arith.addf %227, %228 : vector<2x32xf32>
    %c0_65 = arith.constant 0 : index
    %c7 = arith.constant 7 : index
    %c0_66 = arith.constant 0 : index
    %230 = vector.load %arg15[%c0_65, %c7, %c0_66] : memref<2x8x32xf32, #tpu.memory_space<vmem>>, vector<2x1x32xf32>
    %231 = vector.shape_cast %230 : vector<2x1x32xf32> to vector<2x32xf32>
    %232 = vector.shape_cast %229 : vector<2x32xf32> to vector<2x1x32xf32>
    tpu.vector_store %arg15[%c0_65, %c7, %c0_66], %232 {strides = array<i32>} : memref<2x8x32xf32, #tpu.memory_space<vmem>>, vector<2x1x32xf32>,
    %c0_67 = arith.constant 0 : index
    %c0_68 = arith.constant 0 : index
    %233 = vector.load %arg13[%c0_67, %c0_68] : memref<2x32xf32, #tpu.memory_space<vmem>>, vector<2x32xf32>
    tpu.vector_store %arg13[%c0_67, %c0_68], %229 {strides = array<i32>} : memref<2x32xf32, #tpu.memory_space<vmem>>, vector<2x32xf32>,
    %c0_69 = arith.constant 0 : index
    %c0_70 = arith.constant 0 : index
    %234 = vector.load %arg9[%c0_69, %c0_70] : memref<32x32xf32, #tpu.memory_space<vmem>>, vector<32x32xf32>
    %c0_71 = arith.constant 0 : index
    %c0_72 = arith.constant 0 : index
    %235 = vector.load %arg10[%c0_71, %c0_72] : memref<64x32xf32, #tpu.memory_space<vmem>>, vector<32x32xf32>
    %c32 = arith.constant 32 : index
    %c0_73 = arith.constant 0 : index
    %236 = vector.load %arg10[%c32, %c0_73] : memref<64x32xf32, #tpu.memory_space<vmem>>, vector<32x32xf32>
    %237 = tpu.iota {dimensions = array<i32: 1>} : vector<8x10xi32>
    %c0_74 = arith.constant 0 : index
    %c0_75 = arith.constant 0 : index
    %c0_76 = arith.constant 0 : index
    %238 = vector.load %arg15[%c0_74, %c0_75, %c0_76] : memref<2x8x32xf32, #tpu.memory_space<vmem>>, vector<1x8x32xf32>
    %239 = vector.shape_cast %238 : vector<1x8x32xf32> to vector<8x32xf32>
    %c0_77 = arith.constant 0 : index
    %c0_78 = arith.constant 0 : index
    %c0_79 = arith.constant 0 : index
    %240 = vector.load %arg8[%c0_77, %c0_78, %c0_79] : memref<2x10x32xf32, #tpu.memory_space<vmem>>, vector<1x10x32xf32>
    %241 = vector.shape_cast %240 : vector<1x10x32xf32> to vector<10x32xf32>
    %cst_80 = arith.constant dense<0.000000e+00> : vector<8x32xf32>
    %242 = tpu.matmul %239, %234, %cst_80 {dimension_numbers = #tpu.dot_dimension_numbers<[1], [0], [0], [1], [0, 0, 1, 1], [], []>} : vector<8x32xf32>, vector<32x32xf32>, vector<8x32xf32> -> vector<8x32xf32>
    %cst_81 = arith.constant dense<0.000000e+00> : vector<8x10xf32>
    %243 = tpu.matmul %242, %241, %cst_81 {dimension_numbers = #tpu.dot_dimension_numbers<[1], [1], [0], [0], [0, 0, 1, 0], [], []>} : vector<8x32xf32>, vector<10x32xf32>, vector<8x10xf32> -> vector<8x10xf32>
    %c0_82 = arith.constant 0 : index
    %244 = memref.load %arg1[%c0_82] : memref<2xi32, #tpu.memory_space<smem>>
    %245 = vector.broadcast %244 : i32 to vector<8x10xi32>
    %246 = arith.cmpi slt, %237, %245 : vector<8x10xi32>
    %cst_83 = arith.constant -1.000000e+30 : f32
    %247 = vector.broadcast %cst_83 : f32 to vector<8x10xf32>
    %248 = arith.select %246, %243, %247 : vector<8x10xi1>, vector<8x10xf32>
    %cst_84 = arith.constant dense<0xFF800000> : vector<8xf32>
    %249 = vector.multi_reduction <maximumf>, %248, %cst_84 [1] : vector<8x10xf32> to vector<8xf32>
    %250 = vector.shape_cast %249 : vector<8xf32> to vector<8x1xf32>
    %251 = vector.broadcast %250 : vector<8x1xf32> to vector<8x10xf32>
    %252 = arith.subf %248, %251 : vector<8x10xf32>
    %253 = math.exp %252 : vector<8x10xf32>
    %cst_85 = arith.constant dense<0.000000e+00> : vector<8xf32>
    %254 = vector.multi_reduction <add>, %253, %cst_85 [1] : vector<8x10xf32> to vector<8xf32>
    %255 = vector.shape_cast %254 : vector<8xf32> to vector<8x1xf32>
    %256 = vector.broadcast %255 : vector<8x1xf32> to vector<8x10xf32>
    %257 = arith.divf %253, %256 : vector<8x10xf32>
    %cst_86 = arith.constant dense<0.000000e+00> : vector<8x32xf32>
    %258 = tpu.matmul %257, %241, %cst_86 {dimension_numbers = #tpu.dot_dimension_numbers<[1], [0], [0], [1], [0, 0, 1, 1], [], []>} : vector<8x10xf32>, vector<10x32xf32>, vector<8x32xf32> -> vector<8x32xf32>
    %cst_87 = arith.constant dense<0.000000e+00> : vector<8x32xf32>
    %259 = tpu.matmul %258, %235, %cst_87 {dimension_numbers = #tpu.dot_dimension_numbers<[1], [0], [0], [1], [0, 0, 1, 1], [], []>} : vector<8x32xf32>, vector<32x32xf32>, vector<8x32xf32> -> vector<8x32xf32>
    %cst_88 = arith.constant dense<0.000000e+00> : vector<8x32xf32>
    %260 = tpu.matmul %239, %236, %cst_88 {dimension_numbers = #tpu.dot_dimension_numbers<[1], [0], [0], [1], [0, 0, 1, 1], [], []>} : vector<8x32xf32>, vector<32x32xf32>, vector<8x32xf32> -> vector<8x32xf32>
    %261 = arith.addf %259, %260 : vector<8x32xf32>
    %262 = math.tanh %261 : vector<8x32xf32>
    %c0_89 = arith.constant 0 : index
    %c0_90 = arith.constant 0 : index
    %c0_91 = arith.constant 0 : index
    %263 = vector.load %arg11[%c0_89, %c0_90, %c0_91] : memref<8x2x32xf32, #tpu.memory_space<vmem>>, vector<8x1x32xf32>
    %264 = vector.shape_cast %263 : vector<8x1x32xf32> to vector<8x32xf32>
    %265 = vector.shape_cast %262 : vector<8x32xf32> to vector<8x1x32xf32>
    tpu.vector_store %arg11[%c0_89, %c0_90, %c0_91], %265 {strides = array<i32>} : memref<8x2x32xf32, #tpu.memory_space<vmem>>, vector<8x1x32xf32>,
    %c0_92 = arith.constant 0 : index
    %c0_93 = arith.constant 0 : index
    %c0_94 = arith.constant 0 : index
    %266 = vector.load %arg12[%c0_92, %c0_93, %c0_94] : memref<8x2x10xf32, #tpu.memory_space<vmem>>, vector<8x1x10xf32>
    %267 = vector.shape_cast %266 : vector<8x1x10xf32> to vector<8x10xf32>
    %268 = vector.shape_cast %257 : vector<8x10xf32> to vector<8x1x10xf32>
    tpu.vector_store %arg12[%c0_92, %c0_93, %c0_94], %268 {strides = array<i32>} : memref<8x2x10xf32, #tpu.memory_space<vmem>>, vector<8x1x10xf32>,
    %c1_95 = arith.constant 1 : index
    %c0_96 = arith.constant 0 : index
    %c0_97 = arith.constant 0 : index
    %269 = vector.load %arg15[%c1_95, %c0_96, %c0_97] : memref<2x8x32xf32, #tpu.memory_space<vmem>>, vector<1x8x32xf32>
    %270 = vector.shape_cast %269 : vector<1x8x32xf32> to vector<8x32xf32>
    %c1_98 = arith.constant 1 : index
    %c0_99 = arith.constant 0 : index
    %c0_100 = arith.constant 0 : index
    %271 = vector.load %arg8[%c1_98, %c0_99, %c0_100] : memref<2x10x32xf32, #tpu.memory_space<vmem>>, vector<1x10x32xf32>
    %272 = vector.shape_cast %271 : vector<1x10x32xf32> to vector<10x32xf32>
    %cst_101 = arith.constant dense<0.000000e+00> : vector<8x32xf32>
    %273 = tpu.matmul %270, %234, %cst_101 {dimension_numbers = #tpu.dot_dimension_numbers<[1], [0], [0], [1], [0, 0, 1, 1], [], []>} : vector<8x32xf32>, vector<32x32xf32>, vector<8x32xf32> -> vector<8x32xf32>
    %cst_102 = arith.constant dense<0.000000e+00> : vector<8x10xf32>
    %274 = tpu.matmul %273, %272, %cst_102 {dimension_numbers = #tpu.dot_dimension_numbers<[1], [1], [0], [0], [0, 0, 1, 0], [], []>} : vector<8x32xf32>, vector<10x32xf32>, vector<8x10xf32> -> vector<8x10xf32>
    %c1_103 = arith.constant 1 : index
    %275 = memref.load %arg1[%c1_103] : memref<2xi32, #tpu.memory_space<smem>>
    %276 = vector.broadcast %275 : i32 to vector<8x10xi32>
    %277 = arith.cmpi slt, %237, %276 : vector<8x10xi32>
    %cst_104 = arith.constant -1.000000e+30 : f32
    %278 = vector.broadcast %cst_104 : f32 to vector<8x10xf32>
    %279 = arith.select %277, %274, %278 : vector<8x10xi1>, vector<8x10xf32>
    %cst_105 = arith.constant dense<0xFF800000> : vector<8xf32>
    %280 = vector.multi_reduction <maximumf>, %279, %cst_105 [1] : vector<8x10xf32> to vector<8xf32>
    %281 = vector.shape_cast %280 : vector<8xf32> to vector<8x1xf32>
    %282 = vector.broadcast %281 : vector<8x1xf32> to vector<8x10xf32>
    %283 = arith.subf %279, %282 : vector<8x10xf32>
    %284 = math.exp %283 : vector<8x10xf32>
    %cst_106 = arith.constant dense<0.000000e+00> : vector<8xf32>
    %285 = vector.multi_reduction <add>, %284, %cst_106 [1] : vector<8x10xf32> to vector<8xf32>
    %286 = vector.shape_cast %285 : vector<8xf32> to vector<8x1xf32>
    %287 = vector.broadcast %286 : vector<8x1xf32> to vector<8x10xf32>
    %288 = arith.divf %284, %287 : vector<8x10xf32>
    %cst_107 = arith.constant dense<0.000000e+00> : vector<8x32xf32>
    %289 = tpu.matmul %288, %272, %cst_107 {dimension_numbers = #tpu.dot_dimension_numbers<[1], [0], [0], [1], [0, 0, 1, 1], [], []>} : vector<8x10xf32>, vector<10x32xf32>, vector<8x32xf32> -> vector<8x32xf32>
    %cst_108 = arith.constant dense<0.000000e+00> : vector<8x32xf32>
    %290 = tpu.matmul %289, %235, %cst_108 {dimension_numbers = #tpu.dot_dimension_numbers<[1], [0], [0], [1], [0, 0, 1, 1], [], []>} : vector<8x32xf32>, vector<32x32xf32>, vector<8x32xf32> -> vector<8x32xf32>
    %cst_109 = arith.constant dense<0.000000e+00> : vector<8x32xf32>
    %291 = tpu.matmul %270, %236, %cst_109 {dimension_numbers = #tpu.dot_dimension_numbers<[1], [0], [0], [1], [0, 0, 1, 1], [], []>} : vector<8x32xf32>, vector<32x32xf32>, vector<8x32xf32> -> vector<8x32xf32>
    %292 = arith.addf %290, %291 : vector<8x32xf32>
    %293 = math.tanh %292 : vector<8x32xf32>
    %c0_110 = arith.constant 0 : index
    %c1_111 = arith.constant 1 : index
    %c0_112 = arith.constant 0 : index
    %294 = vector.load %arg11[%c0_110, %c1_111, %c0_112] : memref<8x2x32xf32, #tpu.memory_space<vmem>>, vector<8x1x32xf32>
    %295 = vector.shape_cast %294 : vector<8x1x32xf32> to vector<8x32xf32>
    %296 = vector.shape_cast %293 : vector<8x32xf32> to vector<8x1x32xf32>
    tpu.vector_store %arg11[%c0_110, %c1_111, %c0_112], %296 {strides = array<i32>} : memref<8x2x32xf32, #tpu.memory_space<vmem>>, vector<8x1x32xf32>,
    %c0_113 = arith.constant 0 : index
    %c1_114 = arith.constant 1 : index
    %c0_115 = arith.constant 0 : index
    %297 = vector.load %arg12[%c0_113, %c1_114, %c0_115] : memref<8x2x10xf32, #tpu.memory_space<vmem>>, vector<8x1x10xf32>
    %298 = vector.shape_cast %297 : vector<8x1x10xf32> to vector<8x10xf32>
    %299 = vector.shape_cast %288 : vector<8x10xf32> to vector<8x1x10xf32>
    tpu.vector_store %arg12[%c0_113, %c1_114, %c0_115], %299 {strides = array<i32>} : memref<8x2x10xf32, #tpu.memory_space<vmem>>, vector<8x1x10xf32>,
    return
  }
  func.func @transform_0(%arg0: i32, %arg1: memref<2xi32, #tpu.memory_space<smem>>) -> (i32, i32) {
    %c0_i32 = arith.constant 0 : i32
    %c0_i32_0 = arith.constant 0 : i32
    %c0_i32_1 = arith.constant 0 : i32
    return %c0_i32, %c0_i32_0 : i32, i32
  }
  func.func @transform_1(%arg0: i32, %arg1: memref<2xi32, #tpu.memory_space<smem>>) -> (i32, i32) {
    %c0_i32 = arith.constant 0 : i32
    %c0_i32_0 = arith.constant 0 : i32
    %c0_i32_1 = arith.constant 0 : i32
    return %c0_i32, %c0_i32_0 : i32, i32
  }
  func.func @transform_2(%arg0: i32, %arg1: memref<2xi32, #tpu.memory_space<smem>>) -> (i32, i32) {
    %c0_i32 = arith.constant 0 : i32
    %c0_i32_0 = arith.constant 0 : i32
    %c0_i32_1 = arith.constant 0 : i32
    return %c0_i32, %c0_i32_0 : i32, i32
  }
  func.func @transform_3(%arg0: i32, %arg1: memref<2xi32, #tpu.memory_space<smem>>) -> (i32, i32) {
    %c0_i32 = arith.constant 0 : i32
    %c0_i32_0 = arith.constant 0 : i32
    %c0_i32_1 = arith.constant 0 : i32
    return %c0_i32, %c0_i32_0 : i32, i32
  }
  func.func @transform_4(%arg0: i32, %arg1: memref<2xi32, #tpu.memory_space<smem>>) -> (i32, i32) {
    %c0_i32 = arith.constant 0 : i32
    %c0_i32_0 = arith.constant 0 : i32
    %c0_i32_1 = arith.constant 0 : i32
    return %c0_i32, %c0_i32_0 : i32, i32
  }
  func.func @transform_5(%arg0: i32, %arg1: memref<2xi32, #tpu.memory_space<smem>>) -> (i32, i32) {
    %c0_i32 = arith.constant 0 : i32
    %c0_i32_0 = arith.constant 0 : i32
    %c0_i32_1 = arith.constant 0 : i32
    return %c0_i32, %c0_i32_0 : i32, i32
  }
  func.func @transform_6(%arg0: i32, %arg1: memref<2xi32, #tpu.memory_space<smem>>) -> (i32, i32, i32) {
    %c0_i32 = arith.constant 0 : i32
    %c0_i32_0 = arith.constant 0 : i32
    %c0_i32_1 = arith.constant 0 : i32
    %c0_i32_2 = arith.constant 0 : i32
    return %c0_i32, %c0_i32_0, %c0_i32_1 : i32, i32, i32
  }
  func.func @transform_7(%arg0: i32, %arg1: memref<2xi32, #tpu.memory_space<smem>>) -> (i32, i32) {
    %c0_i32 = arith.constant 0 : i32
    %c0_i32_0 = arith.constant 0 : i32
    %c0_i32_1 = arith.constant 0 : i32
    return %c0_i32, %c0_i32_0 : i32, i32
  }
  func.func @transform_8(%arg0: i32, %arg1: memref<2xi32, #tpu.memory_space<smem>>) -> (i32, i32) {
    %c0_i32 = arith.constant 0 : i32
    %c0_i32_0 = arith.constant 0 : i32
    %c0_i32_1 = arith.constant 0 : i32
    return %c0_i32, %c0_i32_0 : i32, i32
  }
  func.func @transform_9(%arg0: i32, %arg1: memref<2xi32, #tpu.memory_space<smem>>) -> (i32, i32, i32) {
    %c0_i32 = arith.constant 0 : i32
    %c0_i32_0 = arith.constant 0 : i32
    %c0_i32_1 = arith.constant 0 : i32
    %c0_i32_2 = arith.constant 0 : i32
    return %c0_i32, %c0_i32_0, %c0_i32_1 : i32, i32, i32
  }
  func.func @transform_10(%arg0: i32, %arg1: memref<2xi32, #tpu.memory_space<smem>>) -> (i32, i32, i32) {
    %c0_i32 = arith.constant 0 : i32
    %c0_i32_0 = arith.constant 0 : i32
    %c0_i32_1 = arith.constant 0 : i32
    %c0_i32_2 = arith.constant 0 : i32
    return %c0_i32, %c0_i32_0, %c0_i32_1 : i32, i32, i32
  }
  func.func @transform_11(%arg0: i32, %arg1: memref<2xi32, #tpu.memory_space<smem>>) -> (i32, i32) {
    %c0_i32 = arith.constant 0 : i32
    %c0_i32_0 = arith.constant 0 : i32
    %c0_i32_1 = arith.constant 0 : i32
    return %c0_i32, %c0_i32_0 : i32, i32
  }
}

</mosaic_0001>

<bundles_post_ra>
// kernel: decoder_forward.1
= control target key start
LH: loop header
LB: loop body
LE: loop exit
PB: predicated region body
PF: predicated region fallthrough
CT: control target
= control target key end

     0   :  { %s3536_s0 = inlined_call_operand.vmem [shape: s32[2], index: 0, kind: input, shape index: {}]   ;;  %s3537_s1 = inlined_call_operand.vmem [shape: f32[16,32], index: 1, kind: input, shape index: {}]   ;;  %s3538_s2 = inlined_call_operand.vmem [shape: f32[2,32], index: 2, kind: input, shape index: {}]   ;;  %s3539_s3 = inlined_call_operand.vmem [shape: f32[32,96], index: 3, kind: input, shape index: {}]   ;;  %s3540_s4 = inlined_call_operand.vmem [shape: f32[32,96], index: 4, kind: input, shape index: {}]   ;;  %s3541_s5 = inlined_call_operand.vmem [shape: f32[1,96], index: 5, kind: input, shape index: {}]   ;;  %s3542_s6 = inlined_call_operand.vmem [shape: f32[1,96], index: 6, kind: input, shape index: {}]   ;;  %s3543_s7 = inlined_call_operand.vmem [shape: f32[2,10,32], index: 7, kind: input, shape index: {}]   ;;  %s3544_s8 = inlined_call_operand.vmem [shape: f32[32,32], index: 8, kind: input, shape index: {}]   ;;  %s3545_s9 = inlined_call_operand.vmem [shape: f32[64,32], index: 9, kind: input, shape index: {}]   ;;  %s3546_s10 = inlined_call_operand.vmem [shape: f32[8,2,32], index: 10, kind: output, shape index: {0}]   ;;  %s3547_s11 = inlined_call_operand.hbm [shape: f32[8,2,10], index: 11, kind: output, shape index: {1}]   ;;  %s3548_s12 = inlined_call_operand.hbm [shape: f32[2,32], index: 12, kind: output, shape index: {2}]  }
   0x1   :  { %s18_s23 = sshll.u32 %s3536_s0, 4  ;;  %s19_s23 = int_to_ptr.vmem [resolvable:$true] %s18_s23 }
   0x2   :  { %s2774_s24 = scalar_lea.vmem %s19_s23, 16  ;;  %p2779_p1 = scmp.lt.s32.totalorder %s19_s23, %s19_s23 }
   0x3   :  { %p2775_p0 = scmp.ne.s32.totalorder %s19_s23, %s2774_s24  ;;  %p2780_p2 = scmp.lt.s32.totalorder %s2774_s24, %s2774_s24 }
   0x5   :  { %p2781_p3 = por %p2780_p2, %p2779_p1 }
   0x7   :  { %p2782_p4 = pnand %p2781_p3, %p2775_p0 }
   0x9   :  { %2785 = shalt.err (!%p2782_p4)  }
   0xa   :  { %s2832_s25 = smov [#allocation5]  }
   0xb   :  { %21 = dma.vmem_to_smem %s19_s23, 16, %s2832_s25, [#allocation4] }
   0xc   :  { %2826 = dma.done.wait [#allocation4], 16 }
   0xd   :  { %2827 = vsyncadd [#allocation4], 4294967280 }
   0xe   :  { %23 = sfence }
   0xf   :  { %24 = vsyncpa [#allocation7], 0  ;;  %v60_v0 = vld [vmem:[%s3539_s3 + $0x18] sm:$0xff]  ;;  %v59_v2 = vld [vmem:[%s3539_s3 + $0x10] sm:$0xff]  ;;  %v2833_v3 = vmov 0.0  }
  0x10   :  { %v2916_v1 = vld [vmem:[%s3540_s4 + $0x18] sm:$0xff]  ;;  %2511 = vmatprep.subr.mxu0 %v60_v0  ;;  %2522 = vmatprep.subr.mxu1 %v2833_v3  ;;  %v2925_v4 = vld [vmem:[%s3540_s4 + $0x10] sm:$0xff]  ;;  %v58_v5 = vld [vmem:[%s3539_s3 + $0x8] sm:$0xff] }
  0x11   :  { %2512 = vmatpush3.msra.mxu0 %v60_v0  ;;  %2523 = vmatpush3.msra.mxu1 %v2916_v1  ;;  %v2935_v6 = vld [vmem:[%s3540_s4 + $0x8] sm:$0xff]  ;;  %v57_v7 = vld [vmem:[%s3539_s3] sm:$0xff] }
  0x12   :  { %2513 = vmatprep.subr.mxu0 %v59_v2  ;;  %2524 = vmatprep.subr.mxu1 %v2833_v3 }
  0x13   :  { %2514 = vmatpush3.msra.mxu0 %v59_v2  ;;  %2525 = vmatpush3.msra.mxu1 %v2925_v4 }
  0x14   :  { %25 = vsyncpa [#allocation9], 0  ;;  %2515 = vmatprep.subr.mxu0 %v58_v5  ;;  %2526 = vmatprep.subr.mxu1 %v2833_v3  ;;  %v55_v8 = vld [vmem:[%s3537_s1] sm:$0xff]  ;;  %vm67_vm0 = vcmask 261120   ;;  %v56_v10 = vld [vmem:[%s3537_s1 + $0x8] sm:$0xff]  ;;  %vm2834_vm1 = vmmov 0   ;;  %v50_v12 = vlaneseq }
  0x15   :  { %2516 = vmatpush3.msra.mxu0 %v58_v5  ;;  %2527 = vmatpush3.msra.mxu1 %v2935_v6  ;;  %v2949_v9 = vld [vmem:[%s3540_s4] sm:$0xff]  ;;  %vm149_vm3 = vcmask 785408   ;;  %s2837_s0 = smov 32   ;;  %vm300_vm4 = vcmask 253952   ;;  %s1462_s22 = sld [smem:[#allocation5]]  ;;  %vm1466_vm6 = vcmask 80896  }
  0x16   :  { %2517 = vmatprep.subr.mxu0 %v57_v7  ;;  %2528 = vmatprep.subr.mxu1 %v2833_v3  ;;  %v2958_v11 = vld [vmem:[%s3538_s2] sm:$0x3]  ;;  %v2989_v13 = vand.u32 127, %v50_v12  ;;  %v2995_v15 = vshrl.u32 %v50_v12, 7  ;;  %vm1481_vm7 = vcmask 1041408   ;;  %vm1821_vm8 = vcmask 73728  }
  0x17   :  { %2518 = vmatpush3.msra.mxu0 %v57_v7  ;;  %2519 = vmatprep.mubr.msk.f32.mxu0 %vm67_vm0, %v55_v8  ;;  %v49_v14 = vld [vmem:[%s3542_s6] sm:$0x1]  ;;  %s2836_s6 = smov 96   ;;  %vm1293_vm10 = vcmask 254976   ;;  %s2840_s30 = smov [#allocation8]  }
  0x18   :  { %2529 = vmatpush3.msra.mxu1 %v2949_v9  ;;  %2530 = vmatprep.mubr.msk.f32.mxu1 %vm2834_vm1, %v2833_v3  ;;  %vm52_vm2 = vcmp.lt.s32.totalorder %v2989_v13, 64  ;;  %v48_v16 = vld [vmem:[%s3541_s5] sm:$0x1]  ;;  %v3001_v18 = vsub.s32 0, %v2995_v15  ;;  %s2835_s5 = smov 64   ;;  %s2372_s13 = sshll.u32 %s2840_s30, 4  ;;  %s2373_s13 = int_to_ptr.vmem [resolvable:$true] %s2372_s13 }
  0x19   :  { %2520 = vmatmul.mubr.msk.f32.vlgmr.msra.gmra.mxu0 %vm67_vm0, %v56_v10  ;;  %2531 = vmatmul.mubr.msk.f32.vlgmr.msra.gmra.mxu1 %vm67_vm0, %v2958_v11  ;;  %v53_v17 = vsel %vm52_vm2, %v49_v14, 0.0 }
  0x1a   :  { %2533 = vmatprep.subr.mxu0 %v2833_v3  ;;  %2541 = vmatprep.mubr.msk.f32.mxu0 %vm2834_vm1, %v2833_v3  ;;  %v54_v19 = vadd.f32 %v53_v17, %v48_v16  ;;  %v3004_v20 = vrot.slane %v49_v14, %v3001_v18 }
  0x1b   :  { %2534 = vmatpush3.msra.mxu0 %v2916_v1  ;;  %2544 = vmatprep.subr.mxu1 %v2833_v3 }
  0x1c   :  { %2535 = vmatprep.subr.mxu0 %v2833_v3  ;;  %2545 = vmatpush3.msra.mxu1 %v2916_v1  ;;  %v65_v21 = vrot.slane %v54_v19, %v3001_v18 }
  0x1d   :  { %2536 = vmatpush3.msra.mxu0 %v2925_v4  ;;  %2546 = vmatprep.subr.mxu1 %v2833_v3 }
  0x1e   :  { %2537 = vmatprep.subr.mxu0 %v2833_v3  ;;  %2547 = vmatpush3.msra.mxu1 %v2925_v4 }
  0x1f   :  { %2538 = vmatpush3.msra.mxu0 %v2935_v6  ;;  %2548 = vmatprep.subr.mxu1 %v2833_v3 }
  0x20   :  { %2539 = vmatprep.subr.mxu0 %v2833_v3  ;;  %2549 = vmatpush3.msra.mxu1 %v2935_v6 }
  0x21   :  { %2540 = vmatpush3.msra.mxu0 %v2949_v9  ;;  %2550 = vmatprep.subr.mxu1 %v2833_v3 }
  0x22   :  { %2551 = vmatpush3.msra.mxu1 %v2949_v9  ;;  %2552 = vmatprep.mubr.msk.f32.mxu1 %vm2834_vm1, %v2833_v3 }
  0x23   :  { %2555 = vmatprep.subr.mxu0 %v2833_v3  ;;  %2566 = vmatprep.subr.mxu1 %v2833_v3 }
  0xd9   :  { %v2521_v22 = vpop.f32.mrf.mxu0  ;;  %v223_v23 = vpop.f32.mrf.mxu1 }
  0xda   :  { %v146_v24 = vadd.f32 %v2521_v22, %v65_v21  ;;  %v240_v25 = vadd.f32 %v3004_v20, %v223_v23 }
  0xdb   :  { %v140_v26 = vpop.f32.mrf.mxu0  ;;  %v2532_v27 = vpop.f32.mrf.mxu1 }
  0xdc   :  { %151 = vst.msk [vmem:[#allocation2 + $0x8] sm:$0xff] %vm149_vm3, %v146_v24  ;;  %v141_v28 = vadd.f32 %v140_v26, %v65_v21  ;;  %242 = vrot.lane.b32.xlu0 %v240_v25, %s2835_s5 }
  0xde   :  { %150 = vst.msk [vmem:[#allocation2] sm:$0xff] %vm149_vm3, %v141_v28 }
  0xe5   :  { %v153_v29 = vld [vmem:[#allocation2] sm:$0x3]  ;;  %v303_v50 = vld [vmem:[#allocation2 + $0x2] sm:$0x3] }
  0xe6   :  { %v227_v30 = vadd.f32 %v223_v23, %v153_v29 }
  0xe8   :  { %v2389_v31 = vmul.f32 -1.442695, %v227_v30 }
  0xea   :  { %2714 = vpow2.f32 %v2389_v31 }
  0xf7   :  { %v2715_v32 = vpop.eup %2714 }
  0xf8   :  { %v231_v33 = vadd.f32 1.0, %v2715_v32 }
  0xfa   :  { %2716 = vrcp.f32 %v231_v33 }
 0x107   :  { %v2717_v34 = vpop.eup %2716 }
 0x108   :  { %v252_v41 = vsub.f32 1.0, %v2717_v34 }
 0x14e   :  { %v243_v35 = vpop.permute.xlu0 %242 }
 0x14f   :  { %v245_v36 = vmul.f32 %v2717_v34, %v243_v35  ;;  %v585_v35 = vld [vmem:[#allocation2 + $0x6] sm:$0x3] }
 0x151   :  { %247 = vrot.lane.b32.xlu0 %v245_v36, %s2835_s5 }
 0x1c3   :  { %v248_v37 = vpop.permute.xlu0 %247 }
 0x1c4   :  { %v250_v38 = vadd.f32 %v248_v37, %v153_v29 }
 0x1c6   :  { %2718 = vtanh.f32 %v250_v38 }
 0x1d3   :  { %v2719_v39 = vpop.eup %2718 }
 0x1d4   :  { %254 = vrot.lane.b32.xlu1 %v2719_v39, %s2836_s6 }
 0x1d8   :  { %258 = vrot.lane.b32.xlu1 %v2958_v11, %s2837_s0  ;;  %v444_v11 = vld [vmem:[#allocation2 + $0x4] sm:$0x3] }
 0x246   :  { %v255_v40 = vpop.permute.xlu1 %254 }
 0x247   :  { %v257_v43 = vmul.f32 %v255_v40, %v252_v41 }
 0x24a   :  { %v259_v42 = vpop.permute.xlu1 %258 }
 0x24b   :  { %v261_v44 = vmul.f32 %v2717_v34, %v259_v42 }
 0x24d   :  { %v3013_v45 = vadd.f32 %v261_v44, %v257_v43 }
 0x24f   :  { %304 = vrot.lane.b32.xlu0 %v3013_v45, %s2836_s6 }
 0x2c1   :  { %v305_v46 = vpop.permute.xlu0 %304 }
 0x2c2   :  { %2542 = vmatmul.mubr.msk.f32.vlgmr.msra.gmra.mxu0 %vm67_vm0, %v305_v46 }
 0x2c3   :  { %2556 = vmatpush3.msra.mxu0 %v2916_v1  ;;  %2563 = vmatprep.mubr.msk.f32.mxu0 %vm2834_vm1, %v2833_v3 }
 0x2c4   :  { %2557 = vmatprep.subr.mxu0 %v2833_v3 }
 0x2c5   :  { %2558 = vmatpush3.msra.mxu0 %v2925_v4 }
 0x2c6   :  { %2559 = vmatprep.subr.mxu0 %v2833_v3 }
 0x2c7   :  { %2560 = vmatpush3.msra.mxu0 %v2935_v6 }
 0x2c8   :  { %2561 = vmatprep.subr.mxu0 %v2833_v3 }
 0x2c9   :  { %2562 = vmatpush3.msra.mxu0 %v2949_v9 }
 0x2ca   :  { %2577 = vmatprep.subr.mxu0 %v2833_v3 }
 0x382   :  { %v374_v47 = vpop.f32.mrf.mxu0 }
 0x383   :  { %v385_v48 = vadd.f32 %v374_v47, %v3004_v20  ;;  %v378_v51 = vadd.f32 %v374_v47, %v303_v50 }
 0x384   :  { %v2543_v49 = vpop.f32.mrf.mxu0 }
 0x385   :  { %387 = vrot.lane.b32.xlu1 %v385_v48, %s2835_s5  ;;  %v2391_v52 = vmul.f32 -1.442695, %v378_v51 }
 0x387   :  { %2720 = vpow2.f32 %v2391_v52 }
 0x394   :  { %v2721_v53 = vpop.eup %2720 }
 0x395   :  { %v382_v54 = vadd.f32 1.0, %v2721_v53 }
 0x397   :  { %2722 = vrcp.f32 %v382_v54 }
 0x3a4   :  { %v2723_v55 = vpop.eup %2722 }
 0x3a5   :  { %v397_v61 = vsub.f32 1.0, %v2723_v55  ;;  %v403_v63 = vmul.f32 %v2723_v55, %v3013_v45 }
 0x3f7   :  { %v388_v56 = vpop.permute.xlu1 %387 }
 0x3f8   :  { %v390_v57 = vmul.f32 %v2723_v55, %v388_v56  ;;  %v726_v56 = vld [vmem:[#allocation2 + $0x8] sm:$0x3] }
 0x3fa   :  { %392 = vrot.lane.b32.xlu0 %v390_v57, %s2835_s5 }
 0x46c   :  { %v393_v58 = vpop.permute.xlu0 %392 }
 0x46d   :  { %v395_v59 = vadd.f32 %v393_v58, %v303_v50 }
 0x46f   :  { %2724 = vtanh.f32 %v395_v59 }
 0x47c   :  { %v2725_v60 = vpop.eup %2724 }
 0x47d   :  { %399 = vrot.lane.b32.xlu1 %v2725_v60, %s2836_s6 }
 0x4ef   :  { %v400_v62 = vpop.permute.xlu1 %399 }
 0x4f0   :  { %v402_v0 = vmul.f32 %v400_v62, %v397_v61 }
 0x4f2   :  { %v3033_v2 = vadd.f32 %v403_v63, %v402_v0 }
 0x4f4   :  { %445 = vrot.lane.b32.xlu0 %v3033_v2, %s2836_s6 }
 0x566   :  { %v446_v5 = vpop.permute.xlu0 %445 }
 0x567   :  { %2553 = vmatmul.mubr.msk.f32.vlgmr.msra.gmra.mxu1 %vm67_vm0, %v446_v5 }
 0x568   :  { %2567 = vmatpush3.msra.mxu1 %v2916_v1  ;;  %2574 = vmatprep.mubr.msk.f32.mxu1 %vm2834_vm1, %v2833_v3 }
 0x569   :  { %2568 = vmatprep.subr.mxu1 %v2833_v3 }
 0x56a   :  { %2569 = vmatpush3.msra.mxu1 %v2925_v4 }
 0x56b   :  { %2570 = vmatprep.subr.mxu1 %v2833_v3 }
 0x56c   :  { %2571 = vmatpush3.msra.mxu1 %v2935_v6 }
 0x56d   :  { %2572 = vmatprep.subr.mxu1 %v2833_v3 }
 0x56e   :  { %2573 = vmatpush3.msra.mxu1 %v2949_v9 }
 0x56f   :  { %2588 = vmatprep.subr.mxu1 %v2833_v3 }
 0x627   :  { %v515_v7 = vpop.f32.mrf.mxu1 }
 0x628   :  { %v526_v8 = vadd.f32 %v515_v7, %v3004_v20  ;;  %v519_v12 = vadd.f32 %v515_v7, %v444_v11 }
 0x629   :  { %v2554_v10 = vpop.f32.mrf.mxu1 }
 0x62a   :  { %528 = vrot.lane.b32.xlu1 %v526_v8, %s2835_s5  ;;  %v2393_v14 = vmul.f32 -1.442695, %v519_v12 }
 0x62c   :  { %2726 = vpow2.f32 %v2393_v14 }
 0x639   :  { %v2727_v16 = vpop.eup %2726 }
 0x63a   :  { %v523_v17 = vadd.f32 1.0, %v2727_v16 }
 0x63c   :  { %2728 = vrcp.f32 %v523_v17 }
 0x649   :  { %v2729_v19 = vpop.eup %2728 }
 0x64a   :  { %v538_v26 = vsub.f32 1.0, %v2729_v19  ;;  %v544_v28 = vmul.f32 %v2729_v19, %v3033_v2 }
 0x69c   :  { %v529_v21 = vpop.permute.xlu1 %528 }
 0x69d   :  { %v531_v22 = vmul.f32 %v2729_v19, %v529_v21  ;;  %v867_v21 = vld [vmem:[#allocation2 + $0xa] sm:$0x3] }
 0x69f   :  { %533 = vrot.lane.b32.xlu0 %v531_v22, %s2835_s5 }
 0x711   :  { %v534_v23 = vpop.permute.xlu0 %533 }
 0x712   :  { %v536_v24 = vadd.f32 %v534_v23, %v444_v11 }
 0x714   :  { %2730 = vtanh.f32 %v536_v24 }
 0x721   :  { %v2731_v25 = vpop.eup %2730 }
 0x722   :  { %540 = vrot.lane.b32.xlu1 %v2731_v25, %s2836_s6 }
 0x794   :  { %v541_v27 = vpop.permute.xlu1 %540 }
 0x795   :  { %v543_v29 = vmul.f32 %v541_v27, %v538_v26 }
 0x797   :  { %v3053_v30 = vadd.f32 %v544_v28, %v543_v29 }
 0x799   :  { %586 = vrot.lane.b32.xlu0 %v3053_v30, %s2836_s6 }
 0x80b   :  { %v587_v31 = vpop.permute.xlu0 %586 }
 0x80c   :  { %2564 = vmatmul.mubr.msk.f32.vlgmr.msra.gmra.mxu0 %vm67_vm0, %v587_v31 }
 0x80d   :  { %2578 = vmatpush3.msra.mxu0 %v2916_v1  ;;  %2585 = vmatprep.mubr.msk.f32.mxu0 %vm2834_vm1, %v2833_v3 }
 0x80e   :  { %2579 = vmatprep.subr.mxu0 %v2833_v3 }
 0x80f   :  { %2580 = vmatpush3.msra.mxu0 %v2925_v4 }
 0x810   :  { %2581 = vmatprep.subr.mxu0 %v2833_v3 }
 0x811   :  { %2582 = vmatpush3.msra.mxu0 %v2935_v6 }
 0x812   :  { %2583 = vmatprep.subr.mxu0 %v2833_v3 }
 0x813   :  { %2584 = vmatpush3.msra.mxu0 %v2949_v9 }
 0x814   :  { %2599 = vmatprep.subr.mxu0 %v2833_v3 }
 0x8cc   :  { %v656_v32 = vpop.f32.mrf.mxu0 }
 0x8cd   :  { %v667_v33 = vadd.f32 %v656_v32, %v3004_v20  ;;  %v660_v36 = vadd.f32 %v656_v32, %v585_v35 }
 0x8ce   :  { %v2565_v34 = vpop.f32.mrf.mxu0 }
 0x8cf   :  { %669 = vrot.lane.b32.xlu1 %v667_v33, %s2835_s5  ;;  %v2395_v37 = vmul.f32 -1.442695, %v660_v36 }
 0x8d1   :  { %2732 = vpow2.f32 %v2395_v37 }
 0x8de   :  { %v2733_v38 = vpop.eup %2732 }
 0x8df   :  { %v664_v39 = vadd.f32 1.0, %v2733_v38 }
 0x8e1   :  { %2734 = vrcp.f32 %v664_v39  ;;  %v1008_v39 = vld [vmem:[#allocation2 + $0xc] sm:$0x3] }
 0x8ee   :  { %v2735_v40 = vpop.eup %2734 }
 0x8ef   :  { %v679_v47 = vsub.f32 1.0, %v2735_v40  ;;  %v685_v49 = vmul.f32 %v2735_v40, %v3053_v30 }
 0x941   :  { %v670_v41 = vpop.permute.xlu1 %669 }
 0x942   :  { %v672_v42 = vmul.f32 %v2735_v40, %v670_v41 }
 0x944   :  { %674 = vrot.lane.b32.xlu0 %v672_v42, %s2835_s5 }
 0x9b6   :  { %v675_v43 = vpop.permute.xlu0 %674 }
 0x9b7   :  { %v677_v44 = vadd.f32 %v675_v43, %v585_v35 }
 0x9b9   :  { %2736 = vtanh.f32 %v677_v44 }
 0x9c6   :  { %v2737_v46 = vpop.eup %2736 }
 0x9c7   :  { %681 = vrot.lane.b32.xlu1 %v2737_v46, %s2836_s6 }
 0xa39   :  { %v682_v48 = vpop.permute.xlu1 %681 }
 0xa3a   :  { %v684_v50 = vmul.f32 %v682_v48, %v679_v47 }
 0xa3c   :  { %v3073_v51 = vadd.f32 %v685_v49, %v684_v50 }
 0xa3e   :  { %727 = vrot.lane.b32.xlu0 %v3073_v51, %s2836_s6 }
 0xab0   :  { %v728_v52 = vpop.permute.xlu0 %727 }
 0xab1   :  { %2575 = vmatmul.mubr.msk.f32.vlgmr.msra.gmra.mxu1 %vm67_vm0, %v728_v52 }
 0xab2   :  { %2589 = vmatpush3.msra.mxu1 %v2916_v1  ;;  %2596 = vmatprep.mubr.msk.f32.mxu1 %vm2834_vm1, %v2833_v3 }
 0xab3   :  { %2590 = vmatprep.subr.mxu1 %v2833_v3 }
 0xab4   :  { %2591 = vmatpush3.msra.mxu1 %v2925_v4 }
 0xab5   :  { %2592 = vmatprep.subr.mxu1 %v2833_v3 }
 0xab6   :  { %2593 = vmatpush3.msra.mxu1 %v2935_v6 }
 0xab7   :  { %2594 = vmatprep.subr.mxu1 %v2833_v3 }
 0xab8   :  { %2595 = vmatpush3.msra.mxu1 %v2949_v9 }
 0xab9   :  { %2610 = vmatprep.subr.mxu1 %v2833_v3 }
 0xb71   :  { %v797_v53 = vpop.f32.mrf.mxu1 }
 0xb72   :  { %v808_v54 = vadd.f32 %v797_v53, %v3004_v20  ;;  %v801_v57 = vadd.f32 %v797_v53, %v726_v56 }
 0xb73   :  { %v2576_v55 = vpop.f32.mrf.mxu1 }
 0xb74   :  { %810 = vrot.lane.b32.xlu1 %v808_v54, %s2835_s5  ;;  %v2397_v58 = vmul.f32 -1.442695, %v801_v57 }
 0xb76   :  { %2738 = vpow2.f32 %v2397_v58 }
 0xb83   :  { %v2739_v59 = vpop.eup %2738 }
 0xb84   :  { %v805_v60 = vadd.f32 1.0, %v2739_v59 }
 0xb86   :  { %2740 = vrcp.f32 %v805_v60 }
 0xb93   :  { %v2741_v61 = vpop.eup %2740 }
 0xb94   :  { %v820_v8 = vsub.f32 1.0, %v2741_v61  ;;  %v826_v11 = vmul.f32 %v2741_v61, %v3073_v51 }
 0xbe6   :  { %v811_v62 = vpop.permute.xlu1 %810 }
 0xbe7   :  { %v813_v63 = vmul.f32 %v2741_v61, %v811_v62  ;;  %v1149_v61 = vld [vmem:[#allocation2 + $0xe] sm:$0x3] }
 0xbe9   :  { %815 = vrot.lane.b32.xlu0 %v813_v63, %s2835_s5 }
 0xc5b   :  { %v816_v0 = vpop.permute.xlu0 %815 }
 0xc5c   :  { %v818_v5 = vadd.f32 %v816_v0, %v726_v56 }
 0xc5e   :  { %2742 = vtanh.f32 %v818_v5 }
 0xc6b   :  { %v2743_v7 = vpop.eup %2742 }
 0xc6c   :  { %822 = vrot.lane.b32.xlu1 %v2743_v7, %s2836_s6  ;;  %v2838_v7 = vmov 1966171168  }
 0xcde   :  { %v823_v10 = vpop.permute.xlu1 %822 }
 0xcdf   :  { %v825_v12 = vmul.f32 %v823_v10, %v820_v8  ;;  %v265_v8 = vunpack.c.l.s4 %v2838_v7 }
 0xce1   :  { %v3093_v14 = vadd.f32 %v826_v11, %v825_v12  ;;  %v266_v10 = vunpack.c.0.s8 %v265_v8 }
 0xce3   :  { %868 = vrot.lane.b32.xlu0 %v3093_v14, %s2836_s6  ;;  %v3135_v11 = vsub.s32 %v266_v10, %v2995_v15 }
 0xce5   :  { %v3139_v12 = vrot.slane %v3013_v45, %v3135_v11  ;;  %v3150_v15 = vrot.slane %v3093_v14, %v3135_v11 }
 0xd55   :  { %v869_v16 = vpop.permute.xlu0 %868 }
 0xd56   :  { %2586 = vmatmul.mubr.msk.f32.vlgmr.msra.gmra.mxu0 %vm67_vm0, %v869_v16 }
 0xd57   :  { %2600 = vmatpush3.msra.mxu0 %v2916_v1  ;;  %2607 = vmatprep.mubr.msk.f32.mxu0 %vm2834_vm1, %v2833_v3 }
 0xd58   :  { %2601 = vmatprep.subr.mxu0 %v2833_v3 }
 0xd59   :  { %2602 = vmatpush3.msra.mxu0 %v2925_v4 }
 0xd5a   :  { %2603 = vmatprep.subr.mxu0 %v2833_v3 }
 0xd5b   :  { %2604 = vmatpush3.msra.mxu0 %v2935_v6 }
 0xd5c   :  { %2605 = vmatprep.subr.mxu0 %v2833_v3 }
 0xd5d   :  { %2606 = vmatpush3.msra.mxu0 %v2949_v9 }
 0xd5e   :  { %2621 = vmatprep.subr.mxu0 %v2833_v3 }
 0xe16   :  { %v938_v17 = vpop.f32.mrf.mxu0 }
 0xe17   :  { %v949_v1 = vadd.f32 %v938_v17, %v3004_v20  ;;  %v942_v22 = vadd.f32 %v938_v17, %v867_v21  ;;  %v3143_v17 = vrot.slane %v3053_v30, %v3135_v11 }
 0xe18   :  { %v2587_v19 = vpop.f32.mrf.mxu0 }
 0xe19   :  { %951 = vrot.lane.b32.xlu1 %v949_v1, %s2835_s5  ;;  %v2399_v23 = vmul.f32 -1.442695, %v942_v22  ;;  %v278_v19 = vrot.slane %v3139_v12, %v3135_v11  ;;  %v561_v45 = vrot.slane %v3143_v17, %v3135_v11 }
 0xe1b   :  { %2744 = vpow2.f32 %v2399_v23  ;;  %v572_v22 = vrot.slane %v561_v45, %v3001_v18  ;;  %v843_v23 = vrot.slane %v3150_v15, %v3135_v11 }
 0xe28   :  { %v2745_v4 = vpop.eup %2744 }
 0xe29   :  { %v946_v24 = vadd.f32 1.0, %v2745_v4 }
 0xe2b   :  { %2746 = vrcp.f32 %v946_v24 }
 0xe38   :  { %v2747_v6 = vpop.eup %2746 }
 0xe39   :  { %v961_v29 = vsub.f32 1.0, %v2747_v6  ;;  %v967_v32 = vmul.f32 %v2747_v6, %v3093_v14  ;;  %v854_v14 = vrot.slane %v843_v23, %v3001_v18 }
 0xe8b   :  { %v952_v25 = vpop.permute.xlu1 %951 }
 0xe8c   :  { %v954_v26 = vmul.f32 %v2747_v6, %v952_v25 }
 0xe8e   :  { %956 = vrot.lane.b32.xlu0 %v954_v26, %s2835_s5 }
 0xf00   :  { %v957_v9 = vpop.permute.xlu0 %956 }
 0xf01   :  { %v959_v27 = vadd.f32 %v957_v9, %v867_v21  ;;  %v289_v21 = vrot.slane %v278_v19, %v3001_v18 }
 0xf03   :  { %2748 = vtanh.f32 %v959_v27  ;;  %v412_v27 = vrot.slane %v3033_v2, %v3135_v11 }
 0xf10   :  { %v2749_v28 = vpop.eup %2748 }
 0xf11   :  { %963 = vrot.lane.b32.xlu1 %v2749_v28, %s2836_s6 }
 0xf83   :  { %v964_v31 = vpop.permute.xlu1 %963 }
 0xf84   :  { %v966_v33 = vmul.f32 %v964_v31, %v961_v29  ;;  %v694_v29 = vrot.slane %v3073_v51, %v3135_v11  ;;  %v420_v31 = vrot.slane %v412_v27, %v3135_v11 }
 0xf86   :  { %v3113_v34 = vadd.f32 %v967_v32, %v966_v33  ;;  %v702_v2 = vrot.slane %v694_v29, %v3135_v11 }
 0xf88   :  { %1009 = vrot.lane.b32.xlu0 %v3113_v34, %s2836_s6 }
 0xffa   :  { %v1010_v35 = vpop.permute.xlu0 %1009 }
 0xffb   :  { %2597 = vmatmul.mubr.msk.f32.vlgmr.msra.gmra.mxu1 %vm67_vm0, %v1010_v35  ;;  %v976_v35 = vrot.slane %v3113_v34, %v3135_v11 }
 0xffc   :  { %2618 = vmatprep.mubr.msk.f32.mxu1 %vm2834_vm1, %v2833_v3 }
 0xffd   :  { %v984_v51 = vrot.slane %v976_v35, %v3135_v11 }
0x10bb   :  { %v1079_v36 = vpop.f32.mrf.mxu1 }
0x10bc   :  { %v1090_v37 = vadd.f32 %v1079_v36, %v3004_v20  ;;  %v1083_v40 = vadd.f32 %v1079_v36, %v1008_v39  ;;  %v431_v36 = vrot.slane %v420_v31, %v3001_v18 }
0x10bd   :  { %v2598_v38 = vpop.f32.mrf.mxu1 }
0x10be   :  { %1092 = vrot.lane.b32.xlu1 %v1090_v37, %s2835_s5  ;;  %v2401_v41 = vmul.f32 -1.442695, %v1083_v40  ;;  %v713_v37 = vrot.slane %v702_v2, %v3001_v18  ;;  %v995_v38 = vrot.slane %v984_v51, %v3001_v18 }
0x10c0   :  { %2750 = vpow2.f32 %v2401_v41 }
0x10cd   :  { %v2751_v42 = vpop.eup %2750 }
0x10ce   :  { %v1087_v43 = vadd.f32 1.0, %v2751_v42 }
0x10d0   :  { %2752 = vrcp.f32 %v1087_v43 }
0x10dd   :  { %v2753_v44 = vpop.eup %2752 }
0x10de   :  { %v1102_v52 = vsub.f32 1.0, %v2753_v44  ;;  %v1108_v54 = vmul.f32 %v2753_v44, %v3113_v34  ;;  %v3193_v34 = vld [vmem:[%s3544_s8 + $0x18] sm:$0xff] }
0x10df   :  { %2611 = vmatpush3.msra.mxu1 %v3193_v34 }
0x10e0   :  { %2612 = vmatprep.subr.mxu1 %v2833_v3 }
0x1130   :  { %v1093_v46 = vpop.permute.xlu1 %1092 }
0x1131   :  { %v1095_v47 = vmul.f32 %v2753_v44, %v1093_v46  ;;  %v3208_v44 = vld [vmem:[%s3544_s8 + $0x8] sm:$0xff]  ;;  %v3213_v46 = vld [vmem:[%s3544_s8] sm:$0xff] }
0x1133   :  { %1097 = vrot.lane.b32.xlu0 %v1095_v47, %s2835_s5 }
0x11a5   :  { %v1098_v48 = vpop.permute.xlu0 %1097 }
0x11a6   :  { %v1100_v49 = vadd.f32 %v1098_v48, %v1008_v39  ;;  %v3198_v39 = vld [vmem:[%s3544_s8 + $0x10] sm:$0xff] }
0x11a7   :  { %2613 = vmatpush3.msra.mxu1 %v3198_v39 }
0x11a8   :  { %2754 = vtanh.f32 %v1100_v49  ;;  %2614 = vmatprep.subr.mxu1 %v2833_v3 }
0x11a9   :  { %2615 = vmatpush3.msra.mxu1 %v3208_v44 }
0x11aa   :  { %2616 = vmatprep.subr.mxu1 %v2833_v3 }
0x11ab   :  { %2617 = vmatpush3.msra.mxu1 %v3213_v46 }
0x11ac   :  { %2628 = vmatprep.subr.mxu1 %v2833_v3 }
0x11b5   :  { %v2755_v50 = vpop.eup %2754 }
0x11b6   :  { %1104 = vrot.lane.b32.xlu1 %v2755_v50, %s2836_s6  ;;  %v413_v50 = vcombine.high %v412_v27, %v412_v27 }
0x1228   :  { %v1105_v53 = vpop.permute.xlu1 %1104 }
0x1229   :  { %v1107_v55 = vmul.f32 %v1105_v53, %v1102_v52 }
0x122b   :  { %v3125_v56 = vadd.f32 %v1108_v54, %v1107_v55  ;;  %v427_v55 = vrot.slane %v413_v50, %v3135_v11 }
0x122d   :  { %1150 = vrot.lane.b32.xlu0 %v3125_v56, %s2836_s6  ;;  %v3158_v30 = vrot.slane %v3125_v56, %v3135_v11 }
0x122f   :  { %v1125_v4 = vrot.slane %v3158_v30, %v3135_v11 }
0x1231   :  { %v1136_v24 = vrot.slane %v1125_v4, %v3001_v18  ;;  %v271_v4 = vcombine.high %v3139_v12, %v3139_v12  ;;  %v1118_v12 = vcombine.high %v3158_v30, %v3158_v30 }
0x129f   :  { %v1151_v57 = vpop.permute.xlu0 %1150 }
0x12a0   :  { %2608 = vmatmul.mubr.msk.f32.vlgmr.msra.gmra.mxu0 %vm67_vm0, %v1151_v57  ;;  %v3234_v57 = vld [vmem:[%s3543_s7 + $0x8] sm:$0x3] }
0x12a1   :  { %2625 = vmatprep.mubr.msk.f32.mxu0 %vm2834_vm1, %v2833_v3  ;;  %2622 = vmatpush3.xpose.msk.msra.mxu0 %vm67_vm0, %v3234_v57 }
0x12a2   :  { %2623 = vmatprep.subr.mxu0 %v2833_v3 }
0x1360   :  { %v1220_v58 = vpop.f32.mrf.mxu0 }
0x1361   :  { %v1231_v59 = vadd.f32 %v1220_v58, %v3004_v20  ;;  %v1224_v62 = vadd.f32 %v1220_v58, %v1149_v61 }
0x1362   :  { %v2609_v60 = vpop.f32.mrf.mxu0 }
0x1363   :  { %1233 = vrot.lane.b32.xlu1 %v1231_v59, %s2835_s5  ;;  %v2403_v63 = vmul.f32 -1.442695, %v1224_v62  ;;  %v3243_v59 = vld [vmem:[%s3543_s7] sm:$0xff]  ;;  %v435_v60 = vrot.slane %v427_v55, %v3001_v18  ;;  %v977_v62 = vcombine.high %v976_v35, %v976_v35 }
0x1364   :  { %2624 = vmatpush3.xpose.msk.msra.mxu0 %vm67_vm0, %v3243_v59 }
0x1365   :  { %2756 = vpow2.f32 %v2403_v63  ;;  %2646 = vmatprep.subr.mxu0 %v2833_v3 }
0x1372   :  { %v2757_v0 = vpop.eup %2756 }
0x1373   :  { %v1228_v5 = vadd.f32 1.0, %v2757_v0  ;;  %v991_v0 = vrot.slane %v977_v62, %v3135_v11 }
0x1375   :  { %2758 = vrcp.f32 %v1228_v5  ;;  %v999_v5 = vrot.slane %v991_v0, %v3001_v18 }
0x1382   :  { %v2759_v20 = vpop.eup %2758 }
0x1383   :  { %v1243_v40 = vsub.f32 1.0, %v2759_v20  ;;  %v1249_v42 = vmul.f32 %v2759_v20, %v3125_v56  ;;  %v695_v56 = vcombine.high %v694_v29, %v694_v29  ;;  %v1132_v29 = vrot.slane %v1118_v12, %v3135_v11 }
0x1385   :  { %v1140_v31 = vrot.slane %v1132_v29, %v3001_v18 }
0x13d5   :  { %v1234_v16 = vpop.permute.xlu1 %1233 }
0x13d6   :  { %v1236_v1 = vmul.f32 %v2759_v20, %v1234_v16 }
0x13d8   :  { %1238 = vrot.lane.b32.xlu0 %v1236_v1, %s2835_s5 }
0x13dc   :  { %294 = vrot.lane.b32.xlu0 %v289_v21, %s2836_s6  ;;  %v1463_v21 = vstv %s1462_s22 }
0x13dd   :  { %vm1464_vm5 = vcmp.lt.s32.totalorder %v2989_v13, %v1463_v21 }
0x13e0   :  { %577 = vrot.lane.b32.xlu0 %v572_v22, %s2836_s6 }
0x13e4   :  { %859 = vrot.lane.b32.xlu0 %v854_v14, %s2836_s6 }
0x13e8   :  { %1141 = vrot.lane.b32.xlu0 %v1136_v24, %s2836_s6  ;;  %v285_v24 = vrot.slane %v271_v4, %v3135_v11 }
0x144a   :  { %v1239_v6 = vpop.permute.xlu0 %1238 }
0x144b   :  { %v1241_v25 = vadd.f32 %v1239_v6, %v1149_v61  ;;  %v709_v61 = vrot.slane %v695_v56, %v3135_v11  ;;  %v554_v6 = vcombine.high %v3143_v17, %v3143_v17  ;;  %v3339_v56 = vld [vmem:[%s3545_s9 + $0x30] sm:$0xff] }
0x144d   :  { %2760 = vtanh.f32 %v1241_v25  ;;  %v717_v63 = vrot.slane %v709_v61, %v3001_v18  ;;  %v293_v25 = vrot.slane %v285_v24, %v3001_v18 }
0x144e   :  { %v295_v26 = vpop.permute.xlu0 %294 }
0x144f   :  { %301 = vst.msk [vmem:[#allocation3] sm:$0x1] %vm300_vm4, %v295_v26  ;;  %v568_v26 = vrot.slane %v554_v6, %v3135_v11 }
0x1451   :  { %v576_v27 = vrot.slane %v568_v26, %v3001_v18 }
0x1452   :  { %v578_v9 = vpop.permute.xlu0 %577 }
0x1453   :  { %583 = vst.msk [vmem:[#allocation3 + $0x2] sm:$0x1] %vm300_vm4, %v578_v9  ;;  %v836_v9 = vcombine.high %v3150_v15, %v3150_v15 }
0x1456   :  { %v860_v28 = vpop.permute.xlu0 %859 }
0x1457   :  { %865 = vst.msk [vmem:[#allocation3 + $0x4] sm:$0x1] %vm300_vm4, %v860_v28  ;;  %v850_v28 = vrot.slane %v836_v9, %v3135_v11 }
0x1459   :  { %v858_v17 = vrot.slane %v850_v28, %v3001_v18 }
0x145a   :  { %v2761_v32 = vpop.eup %2760  ;;  %v1142_v33 = vpop.permute.xlu0 %1141 }
0x145b   :  { %1147 = vst.msk [vmem:[#allocation3 + $0x6] sm:$0x1] %vm300_vm4, %v1142_v33  ;;  %1245 = vrot.lane.b32.xlu1 %v2761_v32, %s2836_s6 }
0x145f   :  { %436 = vrot.lane.b32.xlu1 %v431_v36, %s2836_s6 }
0x1463   :  { %718 = vrot.lane.b32.xlu1 %v713_v37, %s2836_s6 }
0x1467   :  { %1000 = vrot.lane.b32.xlu1 %v995_v38, %s2836_s6 }
0x14cd   :  { %v1246_v41 = vpop.permute.xlu1 %1245 }
0x14ce   :  { %v1248_v43 = vmul.f32 %v1246_v41, %v1243_v40 }
0x14d0   :  { %v3215_v47 = vadd.f32 %v1249_v42, %v1248_v43  ;;  %v3310_v42 = vld [vmem:[%s3545_s9 + $0x18] sm:$0xff]  ;;  %v3322_v43 = vld [vmem:[%s3545_s9 + $0x8] sm:$0xff] }
0x14d1   :  { %v437_v48 = vpop.permute.xlu1 %436 }
0x14d2   :  { %v3221_v49 = vrot.slane %v3215_v47, %v3135_v11  ;;  %442 = vst.msk [vmem:[#allocation3 + $0x1] sm:$0x1] %vm300_vm4, %v437_v48 }
0x14d4   :  { %v1266_v52 = vrot.slane %v3221_v49, %v3135_v11  ;;  %v1259_v38 = vcombine.high %v3221_v49, %v3221_v49 }
0x14d5   :  { %v719_v53 = vpop.permute.xlu1 %718 }
0x14d6   :  { %724 = vst.msk [vmem:[#allocation3 + $0x3] sm:$0x1] %vm300_vm4, %v719_v53  ;;  %v1277_v54 = vrot.slane %v1266_v52, %v3001_v18  ;;  %v1273_v40 = vrot.slane %v1259_v38, %v3135_v11  ;;  %v3332_v53 = vld [vmem:[%s3545_s9 + $0x38] sm:$0xff] }
0x14d8   :  { %1282 = vrot.lane.b32.xlu1 %v1277_v54, %s2836_s6  ;;  %v1281_v41 = vrot.slane %v1273_v40, %v3001_v18  ;;  %v3315_v18 = vld [vmem:[%s3545_s9 + $0x10] sm:$0xff] }
0x14d9   :  { %v1001_v58 = vpop.permute.xlu1 %1000 }
0x14da   :  { %1006 = vst.msk [vmem:[#allocation3 + $0x5] sm:$0x1] %vm300_vm4, %v1001_v58 }
0x14dc   :  { %438 = vrot.lane.b32.xlu1 %v435_v60, %s2836_s6  ;;  %v3350_v60 = vld [vmem:[%s3545_s9 + $0x28] sm:$0xff] }
0x14e0   :  { %720 = vrot.lane.b32.xlu1 %v717_v63, %s2836_s6 }
0x14e4   :  { %1002 = vrot.lane.b32.xlu1 %v999_v5, %s2836_s6  ;;  %v1303_v5 = vld [vmem:[%s3545_s9 + $0x20] sm:$0xff] }
0x154a   :  { %v1283_v7 = vpop.permute.xlu1 %1282 }
0x154b   :  { %1288 = vst.msk [vmem:[#allocation3 + $0x7] sm:$0x1] %vm300_vm4, %v1283_v7 }
0x154e   :  { %v439_v8 = vpop.permute.xlu1 %438 }
0x154f   :  { %443 = vst.msk [vmem:[#allocation3 + $0x9] sm:$0x1] %vm300_vm4, %v439_v8 }
0x1552   :  { %v721_v10 = vpop.permute.xlu1 %720  ;;  %v3259_v20 = vld [vmem:[#allocation3] sm:$0xff] }
0x1553   :  { %725 = vst.msk [vmem:[#allocation3 + $0xb] sm:$0x1] %vm300_vm4, %v721_v10  ;;  %2619 = vmatmul.mubr.msk.f32.vlgmr.msra.gmra.mxu1 %vm67_vm0, %v3259_v20 }
0x1554   :  { %2632 = vmatprep.mubr.msk.f32.mxu1 %vm2834_vm1, %v2833_v3  ;;  %2629 = vmatpush3.msk.msra.mxu1 %vm1481_vm7, %v3234_v57 }
0x1555   :  { %2630 = vmatprep.subr.mxu1 %v2833_v3 }
0x1556   :  { %v1003_v16 = vpop.permute.xlu1 %1002  ;;  %2631 = vmatpush3.msra.mxu1 %v3243_v59 }
0x1557   :  { %1007 = vst.msk [vmem:[#allocation3 + $0xd] sm:$0x1] %vm300_vm4, %v1003_v16  ;;  %2635 = vmatprep.subr.mxu1 %v2833_v3 }
0x1613   :  { %v1379_v1 = vpop.f32.mrf.mxu1 }
0x1614   :  { %2626 = vmatmul.mubr.msk.f32.vlgmr.msra.gmra.mxu0 %vm67_vm0, %v1379_v1 }
0x1615   :  { %v2620_v19 = vpop.f32.mrf.mxu1  ;;  %2654 = vmatprep.mubr.msk.f32.mxu0 %vm2834_vm1, %v2833_v3  ;;  %2647 = vmatpush3.msra.mxu0 %v3310_v42 }
0x1616   :  { %2648 = vmatprep.subr.mxu0 %v2833_v3 }
0x1617   :  { %2649 = vmatpush3.msra.mxu0 %v3315_v18 }
0x1618   :  { %2650 = vmatprep.subr.mxu0 %v2833_v3 }
0x1619   :  { %2651 = vmatpush3.msra.mxu0 %v3322_v43 }
0x161a   :  { %2652 = vmatprep.subr.mxu0 %v2833_v3 }
0x16d4   :  { %v1458_v45 = vpop.f32.mrf.mxu0 }
0x16d5   :  { %v1465_v22 = vsel %vm1464_vm5, %v1458_v45, -1e+30 }
0x16d6   :  { %v2627_v23 = vpop.f32.mrf.mxu0  ;;  %v1467_v14 = vsel %vm1466_vm6, %v1465_v22, -inf }
0x16d7   :  { %1468 = vmax.xlane.f32.xlu0 %v1467_v14 }
0x16ed   :  { %296 = vrot.lane.b32.xlu0 %v293_v25, %s2836_s6 }
0x16f1   :  { %579 = vrot.lane.b32.xlu0 %v576_v27, %s2836_s6 }
0x16f5   :  { %861 = vrot.lane.b32.xlu0 %v858_v17, %s2836_s6 }
0x16f9   :  { %1143 = vrot.lane.b32.xlu0 %v1140_v31, %s2836_s6 }
0x1760   :  { %v1469_v15 = vpop.xlane.xlu0 %1468 }
0x1761   :  { %v1470_v32 = vsub.f32 %v1465_v22, %v1469_v15 }
0x1763   :  { %v1471_v33 = vmul.f32 1.442695, %v1470_v32 }
0x1764   :  { %v297_v35 = vpop.permute.xlu0 %296 }
0x1765   :  { %2762 = vpow2.f32 %v1471_v33  ;;  %302 = vst.msk [vmem:[#allocation3 + $0x8] sm:$0x1] %vm300_vm4, %v297_v35 }
0x1768   :  { %v580_v30 = vpop.permute.xlu0 %579 }
0x1769   :  { %584 = vst.msk [vmem:[#allocation3 + $0xa] sm:$0x1] %vm300_vm4, %v580_v30 }
0x176c   :  { %v862_v36 = vpop.permute.xlu0 %861 }
0x176d   :  { %866 = vst.msk [vmem:[#allocation3 + $0xc] sm:$0x1] %vm300_vm4, %v862_v36 }
0x1770   :  { %v1144_v2 = vpop.permute.xlu0 %1143 }
0x1771   :  { %1148 = vst.msk [vmem:[#allocation3 + $0xe] sm:$0x1] %vm300_vm4, %v1144_v2 }
0x1772   :  { %v2763_v37 = vpop.eup %2762 }
0x1773   :  { %v1473_v51 = vsel %vm1466_vm6, %v2763_v37, 0.0 }
0x1774   :  { %1474 = vadd.xlane.f32.xlu1 %v1473_v51 }
0x1785   :  { %1284 = vrot.lane.b32.xlu1 %v1281_v41, %s2836_s6 }
0x17fd   :  { %v1475_v48 = vpop.xlane.xlu1 %1474 }
0x17fe   :  { %2764 = vrcp.f32 %v1475_v48 }
0x1801   :  { %v1285_v49 = vpop.permute.xlu1 %1284 }
0x1802   :  { %1289 = vst.msk [vmem:[#allocation3 + $0xf] sm:$0x1] %vm300_vm4, %v1285_v49 }
0x180b   :  { %v2765_v50 = vpop.eup %2764 }
0x180c   :  { %v1477_v52 = vmul.f32 %v2765_v50, %v2763_v37 }
0x180e   :  { %2633 = vmatmul.mubr.msk.f32.vlgmr.msra.gmra.mxu1 %vm1466_vm6, %v1477_v52  ;;  %v1764_v54 = vcombine.high %v1477_v52, %v1477_v52  ;;  %v1771_v55 = vrot.slane %v1477_v52, %v3135_v11 }
0x180f   :  { %2636 = vmatpush3.msra.mxu1 %v3332_v53  ;;  %2643 = vmatprep.mubr.msk.f32.mxu1 %vm2834_vm1, %v2833_v3 }
0x1810   :  { %v1778_v57 = vrot.slane %v1764_v54, %v3135_v11  ;;  %v1779_v58 = vcombine.high %v1771_v55, %v1771_v55  ;;  %v1787_v59 = vrot.slane %v1771_v55, %v3135_v11  ;;  %2637 = vmatprep.subr.mxu1 %v2833_v3 }
0x1811   :  { %2638 = vmatpush3.msra.mxu1 %v3339_v56 }
0x1812   :  { %v1780_v61 = vcombine.high %v1778_v57, %v1778_v57  ;;  %v1794_v62 = vrot.slane %v1778_v57, %v3135_v11  ;;  %v1801_v63 = vrot.slane %v1779_v58, %v3135_v11  ;;  %v1809_v0 = vcombine.high %v1787_v59, %v1787_v59  ;;  %1822 = vst.msk [vmem:[#allocation6] sm:$0x1] %vm1821_vm8, %v1787_v59 }
0x1813   :  { %2639 = vmatprep.subr.mxu1 %v2833_v3 }
0x1814   :  { %2640 = vmatpush3.msra.mxu1 %v3350_v60  ;;  %v1808_v7 = vrot.slane %v1780_v61, %v3135_v11  ;;  %v1810_v8 = vcombine.high %v1794_v62, %v1794_v62  ;;  %v1811_v10 = vcombine.high %v1801_v63, %v1801_v63  ;;  %1823 = vst.msk [vmem:[#allocation6 + $0x2] sm:$0x1] %vm1821_vm8, %v1801_v63  ;;  %1824 = vst.msk [vmem:[#allocation6 + $0x4] sm:$0x1] %vm1821_vm8, %v1809_v0 }
0x1815   :  { %1826 = vst.msk [vmem:[#allocation6 + $0x8] sm:$0x1] %vm1821_vm8, %v1794_v62  ;;  %2641 = vmatprep.subr.mxu1 %v2833_v3 }
0x1816   :  { %2642 = vmatpush3.msra.mxu1 %v1303_v5  ;;  %v1812_v16 = vcombine.high %v1808_v7, %v1808_v7  ;;  %1825 = vst.msk [vmem:[#allocation6 + $0x6] sm:$0x1] %vm1821_vm8, %v1811_v10  ;;  %1827 = vst.msk [vmem:[#allocation6 + $0xa] sm:$0x1] %vm1821_vm8, %v1808_v7 }
0x1817   :  { %1828 = vst.msk [vmem:[#allocation6 + $0xc] sm:$0x1] %vm1821_vm8, %v1810_v8  ;;  %2644 = vmatmul.mubr.msk.f32.vlgmr.msra.gmra.mxu1 %vm67_vm0, %v3259_v20  ;;  %2657 = vmatprep.subr.mxu1 %v2833_v3  ;;  %v1831_v20 = vld [vmem:[#allocation3 + $0x8] sm:$0xff] }
0x1818   :  { %2658 = vmatpush3.msra.mxu1 %v3193_v34  ;;  %2665 = vmatprep.mubr.msk.f32.mxu1 %vm2834_vm1, %v2833_v3  ;;  %1829 = vst.msk [vmem:[#allocation6 + $0xe] sm:$0x1] %vm1821_vm8, %v1812_v16  ;;  %v3389_v34 = vld [vmem:[%s3545_s9] sm:$0xff] }
0x1819   :  { %2659 = vmatprep.subr.mxu1 %v2833_v3  ;;  %2653 = vmatpush3.msra.mxu0 %v3389_v34 }
0x181a   :  { %2660 = vmatpush3.msra.mxu1 %v3198_v39  ;;  %2668 = vmatprep.subr.mxu0 %v2833_v3  ;;  %v2413_v39 = vld [vmem:[%s3543_s7 + $0x18] sm:$0x3] }
0x181b   :  { %2661 = vmatprep.subr.mxu1 %v2833_v3 }
0x181c   :  { %2662 = vmatpush3.msra.mxu1 %v3208_v44  ;;  %v2412_v44 = vld [vmem:[%s3543_s7 + $0x10] sm:$0xff]  ;;  %s2418_s7 = sld [smem:[#allocation5 + $0x1]] }
0x181d   :  { %2663 = vmatprep.subr.mxu1 %v2833_v3 }
0x181e   :  { %2664 = vmatpush3.msra.mxu1 %v3213_v46 }
0x181f   :  { %2666 = vmatmul.mubr.msk.f32.vlgmr.msra.gmra.mxu1 %vm67_vm0, %v1831_v20  ;;  %2675 = vmatprep.subr.mxu1 %v2833_v3 }
0x1820   :  { %2679 = vmatprep.mubr.msk.f32.mxu1 %vm2834_vm1, %v2833_v3  ;;  %2676 = vmatpush3.msk.msra.mxu1 %vm1481_vm7, %v2413_v39 }
0x1821   :  { %2677 = vmatprep.subr.mxu1 %v2833_v3 }
0x1822   :  { %2678 = vmatpush3.msra.mxu1 %v2412_v44  ;;  %v1988_v24 = vstv %s2418_s7 }
0x1823   :  { %2693 = vmatprep.subr.mxu1 %v2833_v3  ;;  %vm1989_vm9 = vcmp.lt.s32.totalorder %v2989_v13, %v1988_v24 }
0x18ce   :  { %v1550_v46 = vpop.f32.mrf.mxu1 }
0x18cf   :  { %2655 = vmatmul.mubr.msk.f32.vlgmr.msra.gmra.mxu0 %vm67_vm0, %v1550_v46 }
0x18d0   :  { %v2634_v1 = vpop.f32.mrf.mxu1  ;;  %2669 = vmatpush3.xpose.msk.msra.mxu0 %vm67_vm0, %v2413_v39  ;;  %2672 = vmatprep.mubr.msk.f32.mxu0 %vm2834_vm1, %v2833_v3 }
0x18d1   :  { %2670 = vmatprep.subr.mxu0 %v2833_v3 }
0x18d4   :  { %2671 = vmatpush3.xpose.msk.msra.mxu0 %vm67_vm0, %v2412_v44 }
0x18d5   :  { %2682 = vmatprep.subr.mxu0 %v2833_v3 }
0x18d7   :  { %v1620_v19 = vpop.f32.mrf.mxu1 }
0x18d9   :  { %v2645_v21 = vpop.f32.mrf.mxu1 }
0x18df   :  { %v1904_v45 = vpop.f32.mrf.mxu1 }
0x18e0   :  { %2673 = vmatmul.mubr.msk.f32.vlgmr.msra.gmra.mxu0 %vm67_vm0, %v1904_v45 }
0x18e1   :  { %2683 = vmatpush3.msra.mxu0 %v3332_v53  ;;  %v2667_v22 = vpop.f32.mrf.mxu1  ;;  %2690 = vmatprep.mubr.msk.f32.mxu0 %vm2834_vm1, %v2833_v3 }
0x18e2   :  { %2684 = vmatprep.subr.mxu0 %v2833_v3 }
0x18e3   :  { %2685 = vmatpush3.msra.mxu0 %v3339_v56 }
0x18e4   :  { %2686 = vmatprep.subr.mxu0 %v2833_v3 }
0x18e5   :  { %2687 = vmatpush3.msra.mxu0 %v3350_v60 }
0x18e6   :  { %2688 = vmatprep.subr.mxu0 %v2833_v3 }
0x18e7   :  { %2689 = vmatpush3.msra.mxu0 %v1303_v5 }
0x18e8   :  { %2691 = vmatmul.mubr.msk.f32.vlgmr.msra.gmra.mxu0 %vm67_vm0, %v1831_v20 }
0x198f   :  { %v1693_v23 = vpop.f32.mrf.mxu0 }
0x1990   :  { %v1694_v14 = vadd.f32 %v1693_v23, %v1620_v19 }
0x1991   :  { %v2656_v4 = vpop.f32.mrf.mxu0 }
0x1992   :  { %2766 = vtanh.f32 %v1694_v14 }
0x199f   :  { %v2767_v6 = vpop.eup %2766 }
0x19a0   :  { %v1983_v25 = vpop.f32.mrf.mxu0  ;;  %v1699_v26 = vcombine.high %v2767_v6, %v2767_v6  ;;  %v1706_v9 = vrot.slane %v2767_v6, %v3135_v11 }
0x19a1   :  { %v1990_v27 = vsel %vm1989_vm9, %v1983_v25, -1e+30 }
0x19a2   :  { %v2674_v28 = vpop.f32.mrf.mxu0  ;;  %v1991_v12 = vsel %vm1466_vm6, %v1990_v27, -inf  ;;  %v1713_v17 = vrot.slane %v1699_v26, %v3135_v11  ;;  %v1714_v29 = vcombine.high %v1706_v9, %v1706_v9  ;;  %v1722_v31 = vrot.slane %v1706_v9, %v3135_v11 }
0x19a3   :  { %1992 = vmax.xlane.f32.xlu0 %v1991_v12 }
0x19a4   :  { %v1715_v15 = vcombine.high %v1713_v17, %v1713_v17  ;;  %v1729_v32 = vrot.slane %v1713_v17, %v3135_v11  ;;  %v1736_v13 = vrot.slane %v1714_v29, %v3135_v11  ;;  %v1744_v33 = vcombine.high %v1722_v31, %v1722_v31  ;;  %1756 = vst.msk [vmem:[%s3546_s10] sm:$0x1] %vm300_vm4, %v1722_v31 }
0x19a6   :  { %v1743_v35 = vrot.slane %v1715_v15, %v3135_v11  ;;  %v1745_v30 = vcombine.high %v1729_v32, %v1729_v32  ;;  %v1746_v36 = vcombine.high %v1736_v13, %v1736_v13  ;;  %1757 = vst.msk [vmem:[%s3546_s10 + $0x2] sm:$0x1] %vm300_vm4, %v1736_v13  ;;  %1758 = vst.msk [vmem:[%s3546_s10 + $0x4] sm:$0x1] %vm300_vm4, %v1744_v33 }
0x19a7   :  { %1760 = vst.msk [vmem:[%s3546_s10 + $0x8] sm:$0x1] %vm300_vm4, %v1729_v32 }
0x19a8   :  { %v3443_v2 = vpop.f32.mrf.mxu0  ;;  %v1747_v37 = vcombine.high %v1743_v35, %v1743_v35  ;;  %1759 = vst.msk [vmem:[%s3546_s10 + $0x6] sm:$0x1] %vm300_vm4, %v1746_v36  ;;  %1761 = vst.msk [vmem:[%s3546_s10 + $0xa] sm:$0x1] %vm300_vm4, %v1743_v35 }
0x19a9   :  { %1762 = vst.msk [vmem:[%s3546_s10 + $0xc] sm:$0x1] %vm300_vm4, %v1745_v30 }
0x19aa   :  { %v2692_v51 = vpop.f32.mrf.mxu0  ;;  %1763 = vst.msk [vmem:[%s3546_s10 + $0xe] sm:$0x1] %vm300_vm4, %v1747_v37 }
0x19b9   :  { %1290 = vrot.lane.b32.xlu0 %v3215_v47, %s2836_s6  ;;  %s2839_s6 = smov [#allocation6]  }
0x19ba   :  { %s2359_s29 = sshll.u32 %s2839_s6, 4  ;;  %s2360_s29 = int_to_ptr.vmem [resolvable:$true] %s2359_s29 }
0x19bb   :  { %s2786_s14 = scalar_lea.vmem %s2360_s29, 256  ;;  %p2791_p6 = scmp.lt.s32.totalorder %s2360_s29, %s2360_s29 }
0x19bc   :  { %p2787_p5 = scmp.ne.s32.totalorder %s2360_s29, %s2786_s14  ;;  %p2792_p7 = scmp.lt.s32.totalorder %s2786_s14, %s2786_s14 }
0x19be   :  { %p2793_p8 = por %p2792_p7, %p2791_p6 }
0x19c0   :  { %p2794_p9 = pnand %p2793_p8, %p2787_p5 }
0x1a2c   :  { %v1993_v38 = vpop.xlane.xlu0 %1992 }
0x1a2d   :  { %v1994_v40 = vsub.f32 %v1990_v27, %v1993_v38 }
0x1a2f   :  { %v1995_v41 = vmul.f32 1.442695, %v1994_v40 }
0x1a30   :  { %v1291_v48 = vpop.permute.xlu0 %1290 }
0x1a31   :  { %2768 = vpow2.f32 %v1995_v41  ;;  %1294 = vst.msk [vmem:[#allocation8] sm:$0x3] %vm1293_vm10, %v1291_v48 }
0x1a3e   :  { %v2769_v49 = vpop.eup %2768 }
0x1a3f   :  { %v1997_v50 = vsel %vm1466_vm6, %v2769_v49, 0.0 }
0x1a40   :  { %1998 = vadd.xlane.f32.xlu1 %v1997_v50 }
0x1ac9   :  { %v1999_v52 = vpop.xlane.xlu1 %1998 }
0x1aca   :  { %2770 = vrcp.f32 %v1999_v52 }
0x1ad7   :  { %v2771_v53 = vpop.eup %2770 }
0x1ad8   :  { %v2001_v54 = vmul.f32 %v2771_v53, %v2769_v49 }
0x1ada   :  { %2680 = vmatmul.mubr.msk.f32.vlgmr.msra.gmra.mxu1 %vm1466_vm6, %v2001_v54  ;;  %v2287_v55 = vcombine.high %v2001_v54, %v2001_v54  ;;  %v2294_v47 = vrot.slane %v2001_v54, %v3135_v11 }
0x1adb   :  { %2694 = vmatpush3.msra.mxu1 %v3310_v42  ;;  %2701 = vmatprep.mubr.msk.f32.mxu1 %vm2834_vm1, %v2833_v3 }
0x1adc   :  { %v2301_v56 = vrot.slane %v2287_v55, %v3135_v11  ;;  %v2302_v57 = vcombine.high %v2294_v47, %v2294_v47  ;;  %v2310_v58 = vrot.slane %v2294_v47, %v3135_v11  ;;  %2695 = vmatprep.subr.mxu1 %v2833_v3 }
0x1add   :  { %2696 = vmatpush3.msra.mxu1 %v3315_v18 }
0x1ade   :  { %v2303_v59 = vcombine.high %v2301_v56, %v2301_v56  ;;  %v2317_v60 = vrot.slane %v2301_v56, %v3135_v11  ;;  %v2324_v61 = vrot.slane %v2302_v57, %v3135_v11  ;;  %v2332_v62 = vcombine.high %v2310_v58, %v2310_v58  ;;  %2344 = vst.msk [vmem:[#allocation6 + $0x1] sm:$0x1] %vm1821_vm8, %v2310_v58 }
0x1adf   :  { %2697 = vmatprep.subr.mxu1 %v2833_v3 }
0x1ae0   :  { %2698 = vmatpush3.msra.mxu1 %v3322_v43  ;;  %v2331_v42 = vrot.slane %v2303_v59, %v3135_v11  ;;  %v2333_v63 = vcombine.high %v2317_v60, %v2317_v60  ;;  %v2334_v0 = vcombine.high %v2324_v61, %v2324_v61  ;;  %2345 = vst.msk [vmem:[#allocation6 + $0x3] sm:$0x1] %vm1821_vm8, %v2324_v61  ;;  %2346 = vst.msk [vmem:[#allocation6 + $0x5] sm:$0x1] %vm1821_vm8, %v2332_v62 }
0x1ae1   :  { %2348 = vst.msk [vmem:[#allocation6 + $0x9] sm:$0x1] %vm1821_vm8, %v2317_v60  ;;  %2699 = vmatprep.subr.mxu1 %v2833_v3 }
0x1ae2   :  { %2700 = vmatpush3.msra.mxu1 %v3389_v34  ;;  %v2335_v18 = vcombine.high %v2331_v42, %v2331_v42  ;;  %2347 = vst.msk [vmem:[#allocation6 + $0x7] sm:$0x1] %vm1821_vm8, %v2334_v0  ;;  %2349 = vst.msk [vmem:[#allocation6 + $0xb] sm:$0x1] %vm1821_vm8, %v2331_v42 }
0x1ae3   :  { %2350 = vst.msk [vmem:[#allocation6 + $0xd] sm:$0x1] %vm1821_vm8, %v2333_v63 }
0x1ae4   :  { %2351 = vst.msk [vmem:[#allocation6 + $0xf] sm:$0x1] %vm1821_vm8, %v2335_v18 }
0x1b9a   :  { %v2073_v43 = vpop.f32.mrf.mxu1 }
0x1b9b   :  { %2702 = vmatmul.mubr.msk.f32.vlgmr.msra.gmra.mxu1 %vm67_vm0, %v2073_v43 }
0x1b9c   :  { %v2681_v5 = vpop.f32.mrf.mxu1 }
0x1b9d   :  { %2797 = shalt.err (!%p2794_p9)
}
0x1b9e   :  { %s2841_s15 = smov 2   ;;  %s2806_s18 = scalar_lea.vmem %s2373_s13, 32 }
0x1b9f   :  { %2365 = dma.vmem_to_hbm [thread:$0]  %s2360_s29, 256, %s3547_s11, [#allocation7], %s2837_s0, %s2837_s0, %s2841_s15  }
0x1ba0   :  { %p2807_p10 = scmp.ne.s32.totalorder %s2373_s13, %s2806_s18  ;;  %p2811_p11 = scmp.lt.s32.totalorder %s2373_s13, %s2373_s13 }
0x1ba1   :  { %p2812_p12 = scmp.lt.s32.totalorder %s2806_s18, %s2806_s18 }
0x1ba3   :  { %p2813_p13 = por %p2812_p12, %p2811_p11 }
0x1ba5   :  { %p2814_p0 = pnand %p2813_p13, %p2807_p10 }
0x1ba7   :  { %2817 = shalt.err (!%p2814_p0)
}
0x1ba8   :  { %2375 = dma.vmem_to_hbm [thread:$0]  %s2373_s13, 32, %s3548_s12, [#allocation9]  }
0x1c5b   :  { %v2216_v3 = vpop.f32.mrf.mxu1 }
0x1c5c   :  { %v2217_v7 = vadd.f32 %v2216_v3, %v3443_v2 }
0x1c5d   :  { %v2703_v8 = vpop.f32.mrf.mxu1 }
0x1c5e   :  { %2772 = vtanh.f32 %v2217_v7 }
0x1c6b   :  { %v2773_v10 = vpop.eup %2772 }
0x1c6c   :  { %v2222_v16 = vcombine.high %v2773_v10, %v2773_v10  ;;  %v2229_v20 = vrot.slane %v2773_v10, %v3135_v11 }
0x1c6e   :  { %v2236_v34 = vrot.slane %v2222_v16, %v3135_v11  ;;  %v2237_v39 = vcombine.high %v2229_v20, %v2229_v20  ;;  %v2245_v44 = vrot.slane %v2229_v20, %v3135_v11 }
0x1c70   :  { %v2238_v46 = vcombine.high %v2236_v34, %v2236_v34  ;;  %v2252_v1 = vrot.slane %v2236_v34, %v3135_v11  ;;  %v2259_v19 = vrot.slane %v2237_v39, %v3135_v11  ;;  %v2267_v21 = vcombine.high %v2245_v44, %v2245_v44  ;;  %2279 = vst.msk [vmem:[%s3546_s10 + $0x1] sm:$0x1] %vm300_vm4, %v2245_v44 }
0x1c72   :  { %v2266_v45 = vrot.slane %v2238_v46, %v3135_v11  ;;  %v2268_v22 = vcombine.high %v2252_v1, %v2252_v1  ;;  %v2269_v23 = vcombine.high %v2259_v19, %v2259_v19  ;;  %2280 = vst.msk [vmem:[%s3546_s10 + $0x3] sm:$0x1] %vm300_vm4, %v2259_v19  ;;  %2281 = vst.msk [vmem:[%s3546_s10 + $0x5] sm:$0x1] %vm300_vm4, %v2267_v21 }
0x1c73   :  { %2283 = vst.msk [vmem:[%s3546_s10 + $0x9] sm:$0x1] %vm300_vm4, %v2252_v1 }
0x1c74   :  { %v2270_v14 = vcombine.high %v2266_v45, %v2266_v45  ;;  %2282 = vst.msk [vmem:[%s3546_s10 + $0x7] sm:$0x1] %vm300_vm4, %v2269_v23  ;;  %2284 = vst.msk [vmem:[%s3546_s10 + $0xb] sm:$0x1] %vm300_vm4, %v2266_v45 }
0x1c75   :  { %2285 = vst.msk [vmem:[%s3546_s10 + $0xd] sm:$0x1] %vm300_vm4, %v2268_v22 }
0x1c76   :  { %2286 = vst.msk [vmem:[%s3546_s10 + $0xf] sm:$0x1] %vm300_vm4, %v2270_v14 }
0x1c77   :  { %2828 = dma.done.wait [#allocation7], 256  }
0x1c78   :  { %2829 = vsyncadd [#allocation7], 4294967040 }
0x1c79   :  { %2830 = dma.done.wait [#allocation9], 32  }
0x1c7a   :  { %2831 = vsyncadd [#allocation9], 4294967264 }
0x1c7b   :  { %2384 = vsyncpa [#allocation7], 1 }
0x1c7c   :  { %2385 = vsyncpa [#allocation9], 1 }

</bundles_post_ra>
